<compile_context>
chip_gen: v5e
topology: v5e:2x2
jax: 0.10.0
libtpu: 0.0.40
codegen_flags: <defaults>
</compile_context>

<pallas_src>
import functools
import math

import jax
import jax.numpy as jnp
from jax.experimental import pallas as pl
from jax.experimental.pallas import tpu as pltpu


# ------------------------- generation-aware VMEM budget -------------------------

def _vmem_limit_bytes():
    # ~75% of physical VMEM: 96 MiB on v5e/v6e (128 MiB), 48 MiB on v7x (64 MiB).
    try:
        cap = int(pltpu.get_tpu_info().vmem_capacity_bytes)
        if cap > 0:
            return (cap * 3) // 4
    except Exception:
        pass
    return 48 * 1024 * 1024  # safe on every generation


_VMEM_LIMIT = _vmem_limit_bytes()


def _cparams(dim_sem):
    return pltpu.CompilerParams(dimension_semantics=dim_sem,
                                vmem_limit_bytes=_VMEM_LIMIT)


# Single-buffer grid-invariant operands (weights, biases, K/V across the q-tile axis):
# halves their VMEM footprint vs. default double buffering.  Fall back cleanly if this
# jax version has no pipeline_mode / Buffered.
def _probe_buffered():
    try:
        pl.BlockSpec((8, 128), lambda i: (0, 0), pipeline_mode=pl.Buffered(1))
        return True
    except Exception:
        return False


_HAS_BUFFERED = _probe_buffered()


def _inv_spec(block_shape, index_map):
    if _HAS_BUFFERED:
        return pl.BlockSpec(block_shape, index_map, pipeline_mode=pl.Buffered(1))
    return pl.BlockSpec(block_shape, index_map)


# --------------------------------- tiling helpers --------------------------------

def _row_tiling(n, target=256):
    """Row (sublane) tile: largest multiple-of-16 divisor of n <= target.
    If none exists, pad n up to a multiple of `target` (caller pads / slices)."""
    if n <= target:
        return n, n
    t = target - target % 16
    while t >= 16:
        if n % t == 0:
            return t, n
        t -= 16
    n_pad = -(-n // target) * target
    return target, n_pad


def _lane_tile(n, target=1024):
    """Lane tile: largest multiple-of-128 divisor of n <= target, else full n."""
    if n <= target:
        return n
    t = target - target % 128
    while t >= 128:
        if n % t == 0:
            return t
        t -= 128
    return n


# ----------------------- fused wide Q|K|V projection kernel -----------------------

def _qkv_kernel(x_ref, w_ref, b_ref, q_ref, k_ref, v_ref, *, n_q, n_k, n_v):
    x = x_ref[...].astype(jnp.bfloat16)            # bf16 MXU operands, f32 accumulate
    y = jnp.dot(x, w_ref[...], preferred_element_type=jnp.float32) + b_ref[...]
    # slice-store into the three bf16 outputs (single wide matmul, x read once)
    q_ref[...] = y[:, :n_q].astype(jnp.bfloat16)
    k_ref[...] = y[:, n_q:n_q + n_k].astype(jnp.bfloat16)
    v_ref[...] = y[:, n_q + n_k:].astype(jnp.bfloat16)


def qkv_projection(x, w_qkv, b_qkv, n_q, n_k, n_v, *, tile_m=256):
    """x: (N, D) f32; w_qkv: (D, n_q+n_k+n_v) bf16; b_qkv: (1, n_q+n_k+n_v) f32."""
    N, D = x.shape
    tm, Np = _row_tiling(N, tile_m)
    if Np != N:
        x = jnp.pad(x, ((0, Np - N), (0, 0)))
    n_tot = n_q + n_k + n_v
    q, k, v = pl.pallas_call(
        functools.partial(_qkv_kernel, n_q=n_q, n_k=n_k, n_v=n_v),
        out_shape=(jax.ShapeDtypeStruct((Np, n_q), jnp.bfloat16),
                   jax.ShapeDtypeStruct((Np, n_k), jnp.bfloat16),
                   jax.ShapeDtypeStruct((Np, n_v), jnp.bfloat16)),
        grid=(Np // tm,),
        in_specs=[
            pl.BlockSpec((tm, D), lambda i: (i, 0)),
            _inv_spec((D, n_tot), lambda i: (0, 0)),
            _inv_spec((1, n_tot), lambda i: (0, 0)),
        ],
        out_specs=(pl.BlockSpec((tm, n_q), lambda i: (i, 0)),
                   pl.BlockSpec((tm, n_k), lambda i: (i, 0)),
                   pl.BlockSpec((tm, n_v), lambda i: (i, 0))),
        compiler_params=_cparams(("parallel",)),
    )(x, w_qkv, b_qkv)
    if Np != N:
        q, k, v = q[:N], k[:N], v[:N]
    return q, k, v


# -------- grouped attention + output projection + residual + LayerNorm kernel -----

def _attn_kernel(q_ref, k_ref, v_ref, bias_ref, res_ref, wo_ref, bo_ref,
                 g_ref, b_ref, o_ref, *, n_heads, n_groups, d_q, d_k, d_v,
                 scale, causal, tq, eps):
    S = k_ref.shape[1]
    hpg = n_heads // n_groups
    qb = q_ref[0]                                  # (tq, H*dq)  bf16
    kb = k_ref[0]                                  # (S,  G*dk)  bf16, shared across heads
    vb = v_ref[0]                                  # (S,  G*dv)  bf16

    # additive key-padding bias, materialized ONCE at (tq, S) (jax does not CSE
    # broadcast_in_dim, so this must not sit inside the per-head loop)
    extra = jnp.broadcast_to(bias_ref[0], (tq, S))
    if causal:
        qi = pl.program_id(1)
        q_pos = qi * tq + jax.lax.broadcasted_iota(jnp.int32, (tq, 1), 0)
        k_pos = jax.lax.broadcasted_iota(jnp.int32, (1, S), 1)
        extra = extra + jnp.where(k_pos <= q_pos, 0.0, -1e30)

    dim_nums = (((1,), (1,)), ((), ()))            # q @ k^T: contract on head dim
    outs = []
    for g in range(n_groups):                      # K/V sliced once per group
        kg = kb[:, g * d_k:(g + 1) * d_k]          # (S, dk)
        vg = vb[:, g * d_v:(g + 1) * d_v]          # (S, dv)
        for j in range(hpg):
            h = g * hpg + j
            qh = qb[:, h * d_q:(h + 1) * d_q]      # (tq, dq)
            s = jax.lax.dot_general(qh, kg, dim_nums,
                                    preferred_element_type=jnp.float32) * scale
            s = s + extra                          # f32 softmax
            m = jnp.max(s, axis=-1, keepdims=True)
            p = jnp.exp(s - m)
            l = jnp.sum(p, axis=-1, keepdims=True)
            p = (p * pl.reciprocal(l, approx=True)).astype(jnp.bfloat16)
            outs.append(jnp.dot(p, vg, preferred_element_type=jnp.float32
                                ).astype(jnp.bfloat16))
    # heads packed contiguously in bf16 (half-width copy, feeds MXU directly)
    attn = jnp.concatenate(outs, axis=-1)          # (tq, H*dv) bf16

    # fused epilogue: output projection + bias + residual + LayerNorm
    y = (jnp.dot(attn, wo_ref[...], preferred_element_type=jnp.float32)
         + bo_ref[...] + res_ref[0])
    mu = jnp.mean(y, axis=-1, keepdims=True)
    yc = y - mu
    var = jnp.mean(yc * yc, axis=-1, keepdims=True)
    o_ref[0] = yc * jax.lax.rsqrt(var + eps) * g_ref[...] + b_ref[...]


def attention_block(q, k, v, bias, res, wo, bo, gamma, beta, *, n_heads,
                    n_groups, causal=False, eps=1e-5, tile_q=256):
    """q: (B,S,H*dq) bf16; k: (B,S,G*dk) bf16; v: (B,S,G*dv) bf16; bias: (B,1,S) f32;
    res: (B,S,D) f32; wo: (H*dv, D) bf16.  Returns LayerNorm(res + attn @ wo + bo)."""
    B, S, Hdq = q.shape
    Gdk, Gdv = k.shape[-1], v.shape[-1]
    D = res.shape[-1]
    H, G = n_heads, n_groups
    d_q, d_k, d_v = Hdq // H, Gdk // G, Gdv // G
    tq, Sp = _row_tiling(S, tile_q)
    if Sp != S:
        tq = S  # padding S would change mask semantics; fall back to a full-S tile
    scale = 1.0 / math.sqrt(d_q)
    kern = functools.partial(_attn_kernel, n_heads=H, n_groups=G,
                             d_q=d_q, d_k=d_k, d_v=d_v, scale=scale,
                             causal=causal, tq=tq, eps=eps)
    # TODO(synk): for long S, add a KV grid axis ("arbitrary") with running
    # max/sum/acc scratch (flash style) instead of full-S K/V + (tq, S) scores.
    return pl.pallas_call(
        kern,
        out_shape=jax.ShapeDtypeStruct((B, S, D), jnp.float32),
        grid=(B, S // tq),
        in_specs=[
            pl.BlockSpec((1, tq, Hdq), lambda b, i: (b, i, 0)),
            _inv_spec((1, S, Gdk), lambda b, i: (b, 0, 0)),
            _inv_spec((1, S, Gdv), lambda b, i: (b, 0, 0)),
            _inv_spec((1, 1, S), lambda b, i: (b, 0, 0)),
            pl.BlockSpec((1, tq, D), lambda b, i: (b, i, 0)),
            _inv_spec((H * d_v, D), lambda b, i: (0, 0)),
            _inv_spec((1, D), lambda b, i: (0, 0)),
            _inv_spec((1, D), lambda b, i: (0, 0)),
            _inv_spec((1, D), lambda b, i: (0, 0)),
        ],
        out_specs=pl.BlockSpec((1, tq, D), lambda b, i: (b, i, 0)),
        compiler_params=_cparams(("parallel", "parallel")),
    )(q, k, v, bias, res, wo, bo.reshape(1, D),
      gamma.reshape(1, D), beta.reshape(1, D))


# ------------- FFN (F-axis tiled, exact GELU) + residual + LayerNorm --------------

def _ffn_kernel(x_ref, w1_ref, b1_ref, w2_ref, b2_ref, g_ref, b_ref, o_ref,
                acc_ref, *, eps):
    f = pl.program_id(1)

    @pl.when(f == 0)
    def _():
        acc_ref[...] = jnp.zeros_like(acc_ref)

    x = x_ref[...]                                 # (tm, D) f32 residual stream
    h = (jnp.dot(x.astype(jnp.bfloat16), w1_ref[...],
                 preferred_element_type=jnp.float32) + b1_ref[...])
    # exact GELU (erf based), f32, matching torch.nn.functional.gelu default
    h = 0.5 * h * (1.0 + jax.lax.erf(h * (1.0 / math.sqrt(2.0))))
    acc_ref[...] += jnp.dot(h.astype(jnp.bfloat16), w2_ref[...],
                            preferred_element_type=jnp.float32)

    @pl.when(f == pl.num_programs(1) - 1)
    def _():
        y = acc_ref[...] + b2_ref[...] + x         # + residual
        mu = jnp.mean(y, axis=-1, keepdims=True)
        yc = y - mu
        var = jnp.mean(yc * yc, axis=-1, keepdims=True)
        o_ref[...] = yc * jax.lax.rsqrt(var + eps) * g_ref[...] + b_ref[...]


def ffn_add_layernorm(x, w1, b1, w2, b2, gamma, beta, *, eps=1e-5,
                      tile_m=256, tile_f=1024):
    """LayerNorm(x + FFN(x)); x: (N, D) f32, w1: (D, F) bf16, w2: (F, D) bf16.
    F axis is tiled ("arbitrary" grid dim) so VMEM is bounded independent of F."""
    N, D = x.shape
    F = w1.shape[1]
    tm, Np = _row_tiling(N, tile_m)
    if Np != N:
        x = jnp.pad(x, ((0, Np - N), (0, 0)))
    tf = _lane_tile(F, tile_f)
    out = pl.pallas_call(
        functools.partial(_ffn_kernel, eps=eps),
        out_shape=jax.ShapeDtypeStruct((Np, D), jnp.float32),
        grid=(Np // tm, F // tf),
        in_specs=[
            pl.BlockSpec((tm, D), lambda i, f: (i, 0)),
            pl.BlockSpec((D, tf), lambda i, f: (0, f)),
            pl.BlockSpec((1, tf), lambda i, f: (0, f)),
            pl.BlockSpec((tf, D), lambda i, f: (f, 0)),
            _inv_spec((1, D), lambda i, f: (0, 0)),
            _inv_spec((1, D), lambda i, f: (0, 0)),
            _inv_spec((1, D), lambda i, f: (0, 0)),
        ],
        out_specs=pl.BlockSpec((tm, D), lambda i, f: (i, 0)),
        scratch_shapes=[pltpu.VMEM((tm, D), jnp.float32)],
        compiler_params=_cparams(("parallel", "arbitrary")),
    )(x, w1, b1.reshape(1, F), w2, b2.reshape(1, D),
      gamma.reshape(1, D), beta.reshape(1, D))
    return out[:N] if Np != N else out


# --------------------------------- model composition ------------------------------

def init_params(key, n_layers, d_model, n_heads, n_groups, d_v=None, d_ff=None):
    d_q = d_model // n_heads
    d_k = d_q
    d_v = d_v or d_q
    d_ff = d_ff or 4 * d_model

    def rnd(k, shape, scale=0.05):
        return (scale * jax.random.normal(k, shape)).astype(jnp.float32)

    params = []
    for _ in range(n_layers):
        keys = jax.random.split(key, 13)
        key = keys[0]
        params.append(dict(
            # head index h = g*heads_per_group + j (group-major), matching the
            # torch.cat order over GroupAttentionHead modules then their Q heads.
            wq=rnd(keys[1], (n_heads, d_model, d_q)),
            bq=rnd(keys[2], (n_heads, d_q)),
            wk=rnd(keys[3], (n_groups, d_model, d_k)),
            bk=rnd(keys[4], (n_groups, d_k)),
            wv=rnd(keys[5], (n_groups, d_model, d_v)),
            bv=rnd(keys[6], (n_groups, d_v)),
            wo=rnd(keys[7], (n_heads * d_v, d_model)),
            bo=rnd(keys[8], (d_model,)),
            ln1_g=jnp.ones((d_model,), jnp.float32),
            ln1_b=jnp.zeros((d_model,), jnp.float32),
            w1=rnd(keys[9], (d_model, d_ff)),
            b1=rnd(keys[10], (d_ff,)),
            w2=rnd(keys[11], (d_ff, d_model)),
            b2=rnd(keys[12], (d_model,)),
            ln2_g=jnp.ones((d_model,), jnp.float32),
            ln2_b=jnp.zeros((d_model,), jnp.float32),
        ))
    return params


def transformer_encoder(x, params, attn_mask=None, *, n_heads, n_groups,
                        is_causal=False):
    """x: (B, S, D). attn_mask: optional bool (B, S), True = attend."""
    B, S, D = x.shape
    H, G = n_heads, n_groups
    N = B * S

    if attn_mask is not None:
        bias = jnp.where(attn_mask.astype(bool), 0.0, -1e30).astype(jnp.float32)
    else:
        bias = jnp.zeros((B, S), jnp.float32)
    bias = bias.reshape(B, 1, S)

    h = x.astype(jnp.float32)                      # residual stream kept in f32
    for lp in params:
        dq = lp["wq"].shape[-1]
        dk = lp["wk"].shape[-1]
        dv = lp["wv"].shape[-1]

        # pack per-head/per-group linears into ONE wide (D, H*dq+G*dk+G*dv) matrix
        # (weight-only host prep; activations never see an XLA transpose)
        wq2 = lp["wq"].transpose(1, 0, 2).reshape(D, H * dq)
        wk2 = lp["wk"].transpose(1, 0, 2).reshape(D, G * dk)
        wv2 = lp["wv"].transpose(1, 0, 2).reshape(D, G * dv)
        w_qkv = jnp.concatenate([wq2, wk2, wv2], axis=1).astype(jnp.bfloat16)
        b_qkv = jnp.concatenate([lp["bq"].reshape(1, H * dq),
                                 lp["bk"].reshape(1, G * dk),
                                 lp["bv"].reshape(1, G * dv)], axis=1)

        # single fused Q/K/V projection (bf16 outputs: half the HBM round trip)
        q, k, v = qkv_projection(h.reshape(N, D), w_qkv, b_qkv,
                                 H * dq, G * dk, G * dv)

        # grouped SDPA + output projection + residual + LayerNorm, one kernel
        h = attention_block(q.reshape(B, S, H * dq),
                            k.reshape(B, S, G * dk),
                            v.reshape(B, S, G * dv),
                            bias, h,
                            lp["wo"].astype(jnp.bfloat16), lp["bo"],
                            lp["ln1_g"], lp["ln1_b"],
                            n_heads=H, n_groups=G, causal=is_causal)

        # FFN (F-tiled, GELU) + residual + LayerNorm, one kernel
        h = ffn_add_layernorm(h.reshape(N, D),
                              lp["w1"].astype(jnp.bfloat16), lp["b1"],
                              lp["w2"].astype(jnp.bfloat16), lp["b2"],
                              lp["ln2_g"], lp["ln2_b"]).reshape(B, S, D)
    return h


# --------------------------------------- main --------------------------------------

if __name__ == "__main__":
    # small config consistent with the module's constraints:
    # d_model % n_heads == 0, n_heads % n_groups == 0
    B, S = 2, 8
    d_model, n_layers, n_heads, n_groups = 32, 2, 4, 2

    key = jax.random.PRNGKey(0)
    kx, kp = jax.random.split(key)
    x = jax.random.normal(kx, (B, S, d_model), dtype=jnp.float32)
    params = init_params(kp, n_layers, d_model, n_heads, n_groups)

    # key-padding mask: batch 0 fully valid, batch 1 has last 2 positions masked
    attn_mask = jnp.arange(S)[None, :] < jnp.array([[S], [S - 2]])

    encoder = jax.jit(functools.partial(
        transformer_encoder, n_heads=n_heads, n_groups=n_groups, is_causal=False))
    out = jax.block_until_ready(encoder(x, params, attn_mask))

    assert out.shape == (B, S, d_model)
    assert bool(jnp.all(jnp.isfinite(out)))
    print("KERNEL_OK")
</pallas_src>

<mosaic_0001>
module attributes {stable_mosaic.version = 11 : i64} {
  func.func @_qkv_kernel(%arg0: i32, %arg1: memref<16x32xf32, #tpu.memory_space<vmem>>, %arg2: memref<32x64xbf16, #tpu.memory_space<vmem>>, %arg3: memref<1x64xf32, #tpu.memory_space<vmem>>, %arg4: memref<16x32xbf16, #tpu.memory_space<vmem>>, %arg5: memref<16x16xbf16, #tpu.memory_space<vmem>>, %arg6: memref<16x16xbf16, #tpu.memory_space<vmem>>) attributes {dimension_semantics = [#tpu.dimension_semantics<parallel>], iteration_bounds = array<i64: 1>, scalar_prefetch = 0 : i64, scratch_operands = 0 : i64, tpu.core_type = #tpu.core_type<tc>, window_params = [{transform_indices = @transform_0, window_bounds = array<i64: 16, 32>}, {pipeline_mode = #tpu.pipeline_mode<synchronous>, transform_indices = @transform_1, window_bounds = array<i64: 32, 64>}, {pipeline_mode = #tpu.pipeline_mode<synchronous>, transform_indices = @transform_2, window_bounds = array<i64: 1, 64>}, {transform_indices = @transform_3, window_bounds = array<i64: 16, 32>}, {transform_indices = @transform_4, window_bounds = array<i64: 16, 16>}, {transform_indices = @transform_5, window_bounds = array<i64: 16, 16>}]} {
    %c0 = arith.constant 0 : index
    %c0_0 = arith.constant 0 : index
    %0 = vector.load %arg1[%c0, %c0_0] : memref<16x32xf32, #tpu.memory_space<vmem>>, vector<16x32xf32>
    %1 = arith.truncf %0 : vector<16x32xf32> to vector<16x32xbf16>
    %c0_1 = arith.constant 0 : index
    %c0_2 = arith.constant 0 : index
    %2 = vector.load %arg2[%c0_1, %c0_2] : memref<32x64xbf16, #tpu.memory_space<vmem>>, vector<32x64xbf16>
    %cst = arith.constant dense<0.000000e+00> : vector<16x64xf32>
    %3 = tpu.matmul %1, %2, %cst {dimension_numbers = #tpu.dot_dimension_numbers<[1], [0], [0], [1], [0, 0, 1, 1], [], []>} : vector<16x32xbf16>, vector<32x64xbf16>, vector<16x64xf32> -> vector<16x64xf32>
    %c0_3 = arith.constant 0 : index
    %c0_4 = arith.constant 0 : index
    %4 = vector.load %arg3[%c0_3, %c0_4] : memref<1x64xf32, #tpu.memory_space<vmem>>, vector<1x64xf32>
    %5 = vector.broadcast %4 : vector<1x64xf32> to vector<16x64xf32>
    %6 = arith.addf %3, %5 : vector<16x64xf32>
    %7 = vector.extract_strided_slice %6 {offsets = [0, 0], sizes = [16, 32], strides = [1, 1]} : vector<16x64xf32> to vector<16x32xf32>
    %8 = arith.truncf %7 : vector<16x32xf32> to vector<16x32xbf16>
    %c0_5 = arith.constant 0 : index
    %c0_6 = arith.constant 0 : index
    %9 = vector.load %arg4[%c0_5, %c0_6] : memref<16x32xbf16, #tpu.memory_space<vmem>>, vector<16x32xbf16>
    tpu.vector_store %arg4[%c0_5, %c0_6], %8 {strides = array<i32>} : memref<16x32xbf16, #tpu.memory_space<vmem>>, vector<16x32xbf16>,
    %10 = vector.extract_strided_slice %6 {offsets = [0, 32], sizes = [16, 16], strides = [1, 1]} : vector<16x64xf32> to vector<16x16xf32>
    %11 = arith.truncf %10 : vector<16x16xf32> to vector<16x16xbf16>
    %c0_7 = arith.constant 0 : index
    %c0_8 = arith.constant 0 : index
    %12 = vector.load %arg5[%c0_7, %c0_8] : memref<16x16xbf16, #tpu.memory_space<vmem>>, vector<16x16xbf16>
    tpu.vector_store %arg5[%c0_7, %c0_8], %11 {strides = array<i32>} : memref<16x16xbf16, #tpu.memory_space<vmem>>, vector<16x16xbf16>,
    %13 = vector.extract_strided_slice %6 {offsets = [0, 48], sizes = [16, 16], strides = [1, 1]} : vector<16x64xf32> to vector<16x16xf32>
    %14 = arith.truncf %13 : vector<16x16xf32> to vector<16x16xbf16>
    %c0_9 = arith.constant 0 : index
    %c0_10 = arith.constant 0 : index
    %15 = vector.load %arg6[%c0_9, %c0_10] : memref<16x16xbf16, #tpu.memory_space<vmem>>, vector<16x16xbf16>
    tpu.vector_store %arg6[%c0_9, %c0_10], %14 {strides = array<i32>} : memref<16x16xbf16, #tpu.memory_space<vmem>>, vector<16x16xbf16>,
    return
  }
  func.func @transform_0(%arg0: i32) -> (i32, i32) {
    %c0_i32 = arith.constant 0 : i32
    %c0_i32_0 = arith.constant 0 : i32
    return %arg0, %c0_i32 : i32, i32
  }
  func.func @transform_1(%arg0: i32) -> (i32, i32) {
    %c0_i32 = arith.constant 0 : i32
    %c0_i32_0 = arith.constant 0 : i32
    %c0_i32_1 = arith.constant 0 : i32
    return %c0_i32, %c0_i32_0 : i32, i32
  }
  func.func @transform_2(%arg0: i32) -> (i32, i32) {
    %c0_i32 = arith.constant 0 : i32
    %c0_i32_0 = arith.constant 0 : i32
    %c0_i32_1 = arith.constant 0 : i32
    return %c0_i32, %c0_i32_0 : i32, i32
  }
  func.func @transform_3(%arg0: i32) -> (i32, i32) {
    %c0_i32 = arith.constant 0 : i32
    %c0_i32_0 = arith.constant 0 : i32
    return %arg0, %c0_i32 : i32, i32
  }
  func.func @transform_4(%arg0: i32) -> (i32, i32) {
    %c0_i32 = arith.constant 0 : i32
    %c0_i32_0 = arith.constant 0 : i32
    return %arg0, %c0_i32 : i32, i32
  }
  func.func @transform_5(%arg0: i32) -> (i32, i32) {
    %c0_i32 = arith.constant 0 : i32
    %c0_i32_0 = arith.constant 0 : i32
    return %arg0, %c0_i32 : i32, i32
  }
}

module attributes {stable_mosaic.version = 11 : i64} {
  func.func @_attn_kernel(%arg0: i32, %arg1: i32, %arg2: memref<1x8x32xbf16, #tpu.memory_space<vmem>>, %arg3: memref<1x8x16xbf16, #tpu.memory_space<vmem>>, %arg4: memref<1x8x16xbf16, #tpu.memory_space<vmem>>, %arg5: memref<1x1x8xf32, #tpu.memory_space<vmem>>, %arg6: memref<1x8x32xf32, #tpu.memory_space<vmem>>, %arg7: memref<32x32xbf16, #tpu.memory_space<vmem>>, %arg8: memref<1x32xf32, #tpu.memory_space<vmem>>, %arg9: memref<1x32xf32, #tpu.memory_space<vmem>>, %arg10: memref<1x32xf32, #tpu.memory_space<vmem>>, %arg11: memref<1x8x32xf32, #tpu.memory_space<vmem>>) attributes {dimension_semantics = [#tpu.dimension_semantics<parallel>, #tpu.dimension_semantics<parallel>], iteration_bounds = array<i64: 2, 1>, scalar_prefetch = 0 : i64, scratch_operands = 0 : i64, tpu.core_type = #tpu.core_type<tc>, window_params = [{transform_indices = @transform_0, window_bounds = array<i64: 1, 8, 32>}, {pipeline_mode = #tpu.pipeline_mode<synchronous>, transform_indices = @transform_1, window_bounds = array<i64: 1, 8, 16>}, {pipeline_mode = #tpu.pipeline_mode<synchronous>, transform_indices = @transform_2, window_bounds = array<i64: 1, 8, 16>}, {pipeline_mode = #tpu.pipeline_mode<synchronous>, transform_indices = @transform_3, window_bounds = array<i64: 1, 1, 8>}, {transform_indices = @transform_4, window_bounds = array<i64: 1, 8, 32>}, {pipeline_mode = #tpu.pipeline_mode<synchronous>, transform_indices = @transform_5, window_bounds = array<i64: 32, 32>}, {pipeline_mode = #tpu.pipeline_mode<synchronous>, transform_indices = @transform_6, window_bounds = array<i64: 1, 32>}, {pipeline_mode = #tpu.pipeline_mode<synchronous>, transform_indices = @transform_7, window_bounds = array<i64: 1, 32>}, {pipeline_mode = #tpu.pipeline_mode<synchronous>, transform_indices = @transform_8, window_bounds = array<i64: 1, 32>}, {transform_indices = @transform_9, window_bounds = array<i64: 1, 8, 32>}]} {
    %c0 = arith.constant 0 : index
    %c0_0 = arith.constant 0 : index
    %c0_1 = arith.constant 0 : index
    %0 = vector.load %arg2[%c0, %c0_0, %c0_1] : memref<1x8x32xbf16, #tpu.memory_space<vmem>>, vector<1x8x32xbf16>
    %1 = vector.shape_cast %0 : vector<1x8x32xbf16> to vector<8x32xbf16>
    %c0_2 = arith.constant 0 : index
    %c0_3 = arith.constant 0 : index
    %c0_4 = arith.constant 0 : index
    %2 = vector.load %arg3[%c0_2, %c0_3, %c0_4] : memref<1x8x16xbf16, #tpu.memory_space<vmem>>, vector<1x8x16xbf16>
    %3 = vector.shape_cast %2 : vector<1x8x16xbf16> to vector<8x16xbf16>
    %c0_5 = arith.constant 0 : index
    %c0_6 = arith.constant 0 : index
    %c0_7 = arith.constant 0 : index
    %4 = vector.load %arg4[%c0_5, %c0_6, %c0_7] : memref<1x8x16xbf16, #tpu.memory_space<vmem>>, vector<1x8x16xbf16>
    %5 = vector.shape_cast %4 : vector<1x8x16xbf16> to vector<8x16xbf16>
    %c0_8 = arith.constant 0 : index
    %c0_9 = arith.constant 0 : index
    %c0_10 = arith.constant 0 : index
    %6 = vector.load %arg5[%c0_8, %c0_9, %c0_10] : memref<1x1x8xf32, #tpu.memory_space<vmem>>, vector<1x1x8xf32>
    %7 = vector.shape_cast %6 : vector<1x1x8xf32> to vector<1x8xf32>
    %8 = vector.shape_cast %7 : vector<1x8xf32> to vector<1x8xf32>
    %9 = vector.broadcast %8 : vector<1x8xf32> to vector<8x8xf32>
    %10 = vector.extract_strided_slice %3 {offsets = [0, 0], sizes = [8, 8], strides = [1, 1]} : vector<8x16xbf16> to vector<8x8xbf16>
    %11 = vector.extract_strided_slice %5 {offsets = [0, 0], sizes = [8, 8], strides = [1, 1]} : vector<8x16xbf16> to vector<8x8xbf16>
    %12 = vector.extract_strided_slice %1 {offsets = [0, 0], sizes = [8, 8], strides = [1, 1]} : vector<8x32xbf16> to vector<8x8xbf16>
    %cst = arith.constant dense<0.000000e+00> : vector<8x8xf32>
    %13 = tpu.matmul %12, %10, %cst {dimension_numbers = #tpu.dot_dimension_numbers<[1], [1], [0], [0], [0, 0, 1, 0], [], []>} : vector<8x8xbf16>, vector<8x8xbf16>, vector<8x8xf32> -> vector<8x8xf32>
    %cst_11 = arith.constant 0.353553385 : f32
    %14 = vector.broadcast %cst_11 : f32 to vector<8x8xf32>
    %15 = arith.mulf %13, %14 : vector<8x8xf32>
    %16 = arith.addf %15, %9 : vector<8x8xf32>
    %cst_12 = arith.constant dense<0xFF800000> : vector<8xf32>
    %17 = vector.multi_reduction <maximumf>, %16, %cst_12 [1] : vector<8x8xf32> to vector<8xf32>
    %18 = vector.shape_cast %17 : vector<8xf32> to vector<8x1xf32>
    %19 = vector.broadcast %18 : vector<8x1xf32> to vector<8x8xf32>
    %20 = arith.subf %16, %19 : vector<8x8xf32>
    %21 = math.exp %20 : vector<8x8xf32>
    %cst_13 = arith.constant dense<0.000000e+00> : vector<8xf32>
    %22 = vector.multi_reduction <add>, %21, %cst_13 [1] : vector<8x8xf32> to vector<8xf32>
    %23 = vector.shape_cast %22 : vector<8xf32> to vector<8x1xf32>
    %24 = tpu.reciprocal %23 {approx = true} : vector<8x1xf32> -> vector<8x1xf32>
    %25 = vector.broadcast %24 : vector<8x1xf32> to vector<8x8xf32>
    %26 = arith.mulf %21, %25 : vector<8x8xf32>
    %27 = arith.truncf %26 : vector<8x8xf32> to vector<8x8xbf16>
    %cst_14 = arith.constant dense<0.000000e+00> : vector<8x8xf32>
    %28 = tpu.matmul %27, %11, %cst_14 {dimension_numbers = #tpu.dot_dimension_numbers<[1], [0], [0], [1], [0, 0, 1, 1], [], []>} : vector<8x8xbf16>, vector<8x8xbf16>, vector<8x8xf32> -> vector<8x8xf32>
    %29 = arith.truncf %28 : vector<8x8xf32> to vector<8x8xbf16>
    %30 = vector.extract_strided_slice %1 {offsets = [0, 8], sizes = [8, 8], strides = [1, 1]} : vector<8x32xbf16> to vector<8x8xbf16>
    %cst_15 = arith.constant dense<0.000000e+00> : vector<8x8xf32>
    %31 = tpu.matmul %30, %10, %cst_15 {dimension_numbers = #tpu.dot_dimension_numbers<[1], [1], [0], [0], [0, 0, 1, 0], [], []>} : vector<8x8xbf16>, vector<8x8xbf16>, vector<8x8xf32> -> vector<8x8xf32>
    %cst_16 = arith.constant 0.353553385 : f32
    %32 = vector.broadcast %cst_16 : f32 to vector<8x8xf32>
    %33 = arith.mulf %31, %32 : vector<8x8xf32>
    %34 = arith.addf %33, %9 : vector<8x8xf32>
    %cst_17 = arith.constant dense<0xFF800000> : vector<8xf32>
    %35 = vector.multi_reduction <maximumf>, %34, %cst_17 [1] : vector<8x8xf32> to vector<8xf32>
    %36 = vector.shape_cast %35 : vector<8xf32> to vector<8x1xf32>
    %37 = vector.broadcast %36 : vector<8x1xf32> to vector<8x8xf32>
    %38 = arith.subf %34, %37 : vector<8x8xf32>
    %39 = math.exp %38 : vector<8x8xf32>
    %cst_18 = arith.constant dense<0.000000e+00> : vector<8xf32>
    %40 = vector.multi_reduction <add>, %39, %cst_18 [1] : vector<8x8xf32> to vector<8xf32>
    %41 = vector.shape_cast %40 : vector<8xf32> to vector<8x1xf32>
    %42 = tpu.reciprocal %41 {approx = true} : vector<8x1xf32> -> vector<8x1xf32>
    %43 = vector.broadcast %42 : vector<8x1xf32> to vector<8x8xf32>
    %44 = arith.mulf %39, %43 : vector<8x8xf32>
    %45 = arith.truncf %44 : vector<8x8xf32> to vector<8x8xbf16>
    %cst_19 = arith.constant dense<0.000000e+00> : vector<8x8xf32>
    %46 = tpu.matmul %45, %11, %cst_19 {dimension_numbers = #tpu.dot_dimension_numbers<[1], [0], [0], [1], [0, 0, 1, 1], [], []>} : vector<8x8xbf16>, vector<8x8xbf16>, vector<8x8xf32> -> vector<8x8xf32>
    %47 = arith.truncf %46 : vector<8x8xf32> to vector<8x8xbf16>
    %48 = vector.extract_strided_slice %3 {offsets = [0, 8], sizes = [8, 8], strides = [1, 1]} : vector<8x16xbf16> to vector<8x8xbf16>
    %49 = vector.extract_strided_slice %5 {offsets = [0, 8], sizes = [8, 8], strides = [1, 1]} : vector<8x16xbf16> to vector<8x8xbf16>
    %50 = vector.extract_strided_slice %1 {offsets = [0, 16], sizes = [8, 8], strides = [1, 1]} : vector<8x32xbf16> to vector<8x8xbf16>
    %cst_20 = arith.constant dense<0.000000e+00> : vector<8x8xf32>
    %51 = tpu.matmul %50, %48, %cst_20 {dimension_numbers = #tpu.dot_dimension_numbers<[1], [1], [0], [0], [0, 0, 1, 0], [], []>} : vector<8x8xbf16>, vector<8x8xbf16>, vector<8x8xf32> -> vector<8x8xf32>
    %cst_21 = arith.constant 0.353553385 : f32
    %52 = vector.broadcast %cst_21 : f32 to vector<8x8xf32>
    %53 = arith.mulf %51, %52 : vector<8x8xf32>
    %54 = arith.addf %53, %9 : vector<8x8xf32>
    %cst_22 = arith.constant dense<0xFF800000> : vector<8xf32>
    %55 = vector.multi_reduction <maximumf>, %54, %cst_22 [1] : vector<8x8xf32> to vector<8xf32>
    %56 = vector.shape_cast %55 : vector<8xf32> to vector<8x1xf32>
    %57 = vector.broadcast %56 : vector<8x1xf32> to vector<8x8xf32>
    %58 = arith.subf %54, %57 : vector<8x8xf32>
    %59 = math.exp %58 : vector<8x8xf32>
    %cst_23 = arith.constant dense<0.000000e+00> : vector<8xf32>
    %60 = vector.multi_reduction <add>, %59, %cst_23 [1] : vector<8x8xf32> to vector<8xf32>
    %61 = vector.shape_cast %60 : vector<8xf32> to vector<8x1xf32>
    %62 = tpu.reciprocal %61 {approx = true} : vector<8x1xf32> -> vector<8x1xf32>
    %63 = vector.broadcast %62 : vector<8x1xf32> to vector<8x8xf32>
    %64 = arith.mulf %59, %63 : vector<8x8xf32>
    %65 = arith.truncf %64 : vector<8x8xf32> to vector<8x8xbf16>
    %cst_24 = arith.constant dense<0.000000e+00> : vector<8x8xf32>
    %66 = tpu.matmul %65, %49, %cst_24 {dimension_numbers = #tpu.dot_dimension_numbers<[1], [0], [0], [1], [0, 0, 1, 1], [], []>} : vector<8x8xbf16>, vector<8x8xbf16>, vector<8x8xf32> -> vector<8x8xf32>
    %67 = arith.truncf %66 : vector<8x8xf32> to vector<8x8xbf16>
    %68 = vector.extract_strided_slice %1 {offsets = [0, 24], sizes = [8, 8], strides = [1, 1]} : vector<8x32xbf16> to vector<8x8xbf16>
    %cst_25 = arith.constant dense<0.000000e+00> : vector<8x8xf32>
    %69 = tpu.matmul %68, %48, %cst_25 {dimension_numbers = #tpu.dot_dimension_numbers<[1], [1], [0], [0], [0, 0, 1, 0], [], []>} : vector<8x8xbf16>, vector<8x8xbf16>, vector<8x8xf32> -> vector<8x8xf32>
    %cst_26 = arith.constant 0.353553385 : f32
    %70 = vector.broadcast %cst_26 : f32 to vector<8x8xf32>
    %71 = arith.mulf %69, %70 : vector<8x8xf32>
    %72 = arith.addf %71, %9 : vector<8x8xf32>
    %cst_27 = arith.constant dense<0xFF800000> : vector<8xf32>
    %73 = vector.multi_reduction <maximumf>, %72, %cst_27 [1] : vector<8x8xf32> to vector<8xf32>
    %74 = vector.shape_cast %73 : vector<8xf32> to vector<8x1xf32>
    %75 = vector.broadcast %74 : vector<8x1xf32> to vector<8x8xf32>
    %76 = arith.subf %72, %75 : vector<8x8xf32>
    %77 = math.exp %76 : vector<8x8xf32>
    %cst_28 = arith.constant dense<0.000000e+00> : vector<8xf32>
    %78 = vector.multi_reduction <add>, %77, %cst_28 [1] : vector<8x8xf32> to vector<8xf32>
    %79 = vector.shape_cast %78 : vector<8xf32> to vector<8x1xf32>
    %80 = tpu.reciprocal %79 {approx = true} : vector<8x1xf32> -> vector<8x1xf32>
    %81 = vector.broadcast %80 : vector<8x1xf32> to vector<8x8xf32>
    %82 = arith.mulf %77, %81 : vector<8x8xf32>
    %83 = arith.truncf %82 : vector<8x8xf32> to vector<8x8xbf16>
    %cst_29 = arith.constant dense<0.000000e+00> : vector<8x8xf32>
    %84 = tpu.matmul %83, %49, %cst_29 {dimension_numbers = #tpu.dot_dimension_numbers<[1], [0], [0], [1], [0, 0, 1, 1], [], []>} : vector<8x8xbf16>, vector<8x8xbf16>, vector<8x8xf32> -> vector<8x8xf32>
    %85 = arith.truncf %84 : vector<8x8xf32> to vector<8x8xbf16>
    %86 = tpu.concatenate %29, %47, %67, %85 in 1 : vector<8x8xbf16>, vector<8x8xbf16>, vector<8x8xbf16>, vector<8x8xbf16> -> vector<8x32xbf16>
    %c0_30 = arith.constant 0 : index
    %c0_31 = arith.constant 0 : index
    %87 = vector.load %arg7[%c0_30, %c0_31] : memref<32x32xbf16, #tpu.memory_space<vmem>>, vector<32x32xbf16>
    %cst_32 = arith.constant dense<0.000000e+00> : vector<8x32xf32>
    %88 = tpu.matmul %86, %87, %cst_32 {dimension_numbers = #tpu.dot_dimension_numbers<[1], [0], [0], [1], [0, 0, 1, 1], [], []>} : vector<8x32xbf16>, vector<32x32xbf16>, vector<8x32xf32> -> vector<8x32xf32>
    %c0_33 = arith.constant 0 : index
    %c0_34 = arith.constant 0 : index
    %89 = vector.load %arg8[%c0_33, %c0_34] : memref<1x32xf32, #tpu.memory_space<vmem>>, vector<1x32xf32>
    %90 = vector.broadcast %89 : vector<1x32xf32> to vector<8x32xf32>
    %91 = arith.addf %88, %90 : vector<8x32xf32>
    %c0_35 = arith.constant 0 : index
    %c0_36 = arith.constant 0 : index
    %c0_37 = arith.constant 0 : index
    %92 = vector.load %arg6[%c0_35, %c0_36, %c0_37] : memref<1x8x32xf32, #tpu.memory_space<vmem>>, vector<1x8x32xf32>
    %93 = vector.shape_cast %92 : vector<1x8x32xf32> to vector<8x32xf32>
    %94 = arith.addf %91, %93 : vector<8x32xf32>
    %cst_38 = arith.constant dense<0.000000e+00> : vector<8xf32>
    %95 = vector.multi_reduction <add>, %94, %cst_38 [1] : vector<8x32xf32> to vector<8xf32>
    %96 = vector.shape_cast %95 : vector<8xf32> to vector<8x1xf32>
    %cst_39 = arith.constant 3.200000e+01 : f32
    %97 = vector.broadcast %cst_39 : f32 to vector<8x1xf32>
    %98 = arith.divf %96, %97 : vector<8x1xf32>
    %99 = vector.broadcast %98 : vector<8x1xf32> to vector<8x32xf32>
    %100 = arith.subf %94, %99 : vector<8x32xf32>
    %101 = arith.mulf %100, %100 : vector<8x32xf32>
    %cst_40 = arith.constant dense<0.000000e+00> : vector<8xf32>
    %102 = vector.multi_reduction <add>, %101, %cst_40 [1] : vector<8x32xf32> to vector<8xf32>
    %103 = vector.shape_cast %102 : vector<8xf32> to vector<8x1xf32>
    %cst_41 = arith.constant 3.200000e+01 : f32
    %104 = vector.broadcast %cst_41 : f32 to vector<8x1xf32>
    %105 = arith.divf %103, %104 : vector<8x1xf32>
    %cst_42 = arith.constant 9.99999974E-6 : f32
    %106 = vector.broadcast %cst_42 : f32 to vector<8x1xf32>
    %107 = arith.addf %105, %106 : vector<8x1xf32>
    %108 = math.rsqrt %107 : vector<8x1xf32>
    %109 = vector.broadcast %108 : vector<8x1xf32> to vector<8x32xf32>
    %110 = arith.mulf %100, %109 : vector<8x32xf32>
    %c0_43 = arith.constant 0 : index
    %c0_44 = arith.constant 0 : index
    %111 = vector.load %arg9[%c0_43, %c0_44] : memref<1x32xf32, #tpu.memory_space<vmem>>, vector<1x32xf32>
    %112 = vector.broadcast %111 : vector<1x32xf32> to vector<8x32xf32>
    %113 = arith.mulf %110, %112 : vector<8x32xf32>
    %c0_45 = arith.constant 0 : index
    %c0_46 = arith.constant 0 : index
    %114 = vector.load %arg10[%c0_45, %c0_46] : memref<1x32xf32, #tpu.memory_space<vmem>>, vector<1x32xf32>
    %115 = vector.broadcast %114 : vector<1x32xf32> to vector<8x32xf32>
    %116 = arith.addf %113, %115 : vector<8x32xf32>
    %c0_47 = arith.constant 0 : index
    %c0_48 = arith.constant 0 : index
    %c0_49 = arith.constant 0 : index
    %117 = vector.load %arg11[%c0_47, %c0_48, %c0_49] : memref<1x8x32xf32, #tpu.memory_space<vmem>>, vector<1x8x32xf32>
    %118 = vector.shape_cast %117 : vector<1x8x32xf32> to vector<8x32xf32>
    %119 = vector.shape_cast %116 : vector<8x32xf32> to vector<1x8x32xf32>
    tpu.vector_store %arg11[%c0_47, %c0_48, %c0_49], %119 {strides = array<i32>} : memref<1x8x32xf32, #tpu.memory_space<vmem>>, vector<1x8x32xf32>,
    return
  }
  func.func @transform_0(%arg0: i32, %arg1: i32) -> (i32, i32, i32) {
    %c0_i32 = arith.constant 0 : i32
    %c0_i32_0 = arith.constant 0 : i32
    return %arg0, %arg1, %c0_i32 : i32, i32, i32
  }
  func.func @transform_1(%arg0: i32, %arg1: i32) -> (i32, i32, i32) {
    %c0_i32 = arith.constant 0 : i32
    %c0_i32_0 = arith.constant 0 : i32
    %c0_i32_1 = arith.constant 0 : i32
    return %arg0, %c0_i32, %c0_i32_0 : i32, i32, i32
  }
  func.func @transform_2(%arg0: i32, %arg1: i32) -> (i32, i32, i32) {
    %c0_i32 = arith.constant 0 : i32
    %c0_i32_0 = arith.constant 0 : i32
    %c0_i32_1 = arith.constant 0 : i32
    return %arg0, %c0_i32, %c0_i32_0 : i32, i32, i32
  }
  func.func @transform_3(%arg0: i32, %arg1: i32) -> (i32, i32, i32) {
    %c0_i32 = arith.constant 0 : i32
    %c0_i32_0 = arith.constant 0 : i32
    %c0_i32_1 = arith.constant 0 : i32
    return %arg0, %c0_i32, %c0_i32_0 : i32, i32, i32
  }
  func.func @transform_4(%arg0: i32, %arg1: i32) -> (i32, i32, i32) {
    %c0_i32 = arith.constant 0 : i32
    %c0_i32_0 = arith.constant 0 : i32
    return %arg0, %arg1, %c0_i32 : i32, i32, i32
  }
  func.func @transform_5(%arg0: i32, %arg1: i32) -> (i32, i32) {
    %c0_i32 = arith.constant 0 : i32
    %c0_i32_0 = arith.constant 0 : i32
    %c0_i32_1 = arith.constant 0 : i32
    return %c0_i32, %c0_i32_0 : i32, i32
  }
  func.func @transform_6(%arg0: i32, %arg1: i32) -> (i32, i32) {
    %c0_i32 = arith.constant 0 : i32
    %c0_i32_0 = arith.constant 0 : i32
    %c0_i32_1 = arith.constant 0 : i32
    return %c0_i32, %c0_i32_0 : i32, i32
  }
  func.func @transform_7(%arg0: i32, %arg1: i32) -> (i32, i32) {
    %c0_i32 = arith.constant 0 : i32
    %c0_i32_0 = arith.constant 0 : i32
    %c0_i32_1 = arith.constant 0 : i32
    return %c0_i32, %c0_i32_0 : i32, i32
  }
  func.func @transform_8(%arg0: i32, %arg1: i32) -> (i32, i32) {
    %c0_i32 = arith.constant 0 : i32
    %c0_i32_0 = arith.constant 0 : i32
    %c0_i32_1 = arith.constant 0 : i32
    return %c0_i32, %c0_i32_0 : i32, i32
  }
  func.func @transform_9(%arg0: i32, %arg1: i32) -> (i32, i32, i32) {
    %c0_i32 = arith.constant 0 : i32
    %c0_i32_0 = arith.constant 0 : i32
    return %arg0, %arg1, %c0_i32 : i32, i32, i32
  }
}

module attributes {stable_mosaic.version = 11 : i64} {
  func.func @_ffn_kernel(%arg0: i32, %arg1: i32, %arg2: memref<16x32xf32, #tpu.memory_space<vmem>>, %arg3: memref<32x128xbf16, #tpu.memory_space<vmem>>, %arg4: memref<1x128xf32, #tpu.memory_space<vmem>>, %arg5: memref<128x32xbf16, #tpu.memory_space<vmem>>, %arg6: memref<1x32xf32, #tpu.memory_space<vmem>>, %arg7: memref<1x32xf32, #tpu.memory_space<vmem>>, %arg8: memref<1x32xf32, #tpu.memory_space<vmem>>, %arg9: memref<16x32xf32, #tpu.memory_space<vmem>>, %arg10: memref<16x32xf32, #tpu.memory_space<vmem>>) attributes {dimension_semantics = [#tpu.dimension_semantics<parallel>, #tpu.dimension_semantics<arbitrary>], iteration_bounds = array<i64: 1, 1>, scalar_prefetch = 0 : i64, scratch_operands = 1 : i64, tpu.core_type = #tpu.core_type<tc>, window_params = [{transform_indices = @transform_0, window_bounds = array<i64: 16, 32>}, {transform_indices = @transform_1, window_bounds = array<i64: 32, 128>}, {transform_indices = @transform_2, window_bounds = array<i64: 1, 128>}, {transform_indices = @transform_3, window_bounds = array<i64: 128, 32>}, {pipeline_mode = #tpu.pipeline_mode<synchronous>, transform_indices = @transform_4, window_bounds = array<i64: 1, 32>}, {pipeline_mode = #tpu.pipeline_mode<synchronous>, transform_indices = @transform_5, window_bounds = array<i64: 1, 32>}, {pipeline_mode = #tpu.pipeline_mode<synchronous>, transform_indices = @transform_6, window_bounds = array<i64: 1, 32>}, {transform_indices = @transform_7, window_bounds = array<i64: 16, 32>}]} {
    %c0_i32 = arith.constant 0 : i32
    %0 = arith.cmpi eq, %arg1, %c0_i32 : i32
    %1 = arith.extui %0 : i1 to i32
    %c0_i32_0 = arith.constant 0 : i32
    %2 = arith.cmpi ne, %1, %c0_i32_0 : i32
    scf.if %2 {
      %cst_18 = arith.constant 0.000000e+00 : f32
      %27 = vector.broadcast %cst_18 : f32 to vector<16x32xf32>
      %c0_19 = arith.constant 0 : index
      %c0_20 = arith.constant 0 : index
      %28 = vector.load %arg10[%c0_19, %c0_20] : memref<16x32xf32, #tpu.memory_space<vmem>>, vector<16x32xf32>
      tpu.vector_store %arg10[%c0_19, %c0_20], %27 {strides = array<i32>} : memref<16x32xf32, #tpu.memory_space<vmem>>, vector<16x32xf32>,
    } else {
    }
    %c0 = arith.constant 0 : index
    %c0_1 = arith.constant 0 : index
    %3 = vector.load %arg2[%c0, %c0_1] : memref<16x32xf32, #tpu.memory_space<vmem>>, vector<16x32xf32>
    %4 = arith.truncf %3 : vector<16x32xf32> to vector<16x32xbf16>
    %c0_2 = arith.constant 0 : index
    %c0_3 = arith.constant 0 : index
    %5 = vector.load %arg3[%c0_2, %c0_3] : memref<32x128xbf16, #tpu.memory_space<vmem>>, vector<32x128xbf16>
    %cst = arith.constant dense<0.000000e+00> : vector<16x128xf32>
    %6 = tpu.matmul %4, %5, %cst {dimension_numbers = #tpu.dot_dimension_numbers<[1], [0], [0], [1], [0, 0, 1, 1], [], []>} : vector<16x32xbf16>, vector<32x128xbf16>, vector<16x128xf32> -> vector<16x128xf32>
    %c0_4 = arith.constant 0 : index
    %c0_5 = arith.constant 0 : index
    %7 = vector.load %arg4[%c0_4, %c0_5] : memref<1x128xf32, #tpu.memory_space<vmem>>, vector<1x128xf32>
    %8 = vector.broadcast %7 : vector<1x128xf32> to vector<16x128xf32>
    %9 = arith.addf %6, %8 : vector<16x128xf32>
    %cst_6 = arith.constant 5.000000e-01 : f32
    %10 = vector.broadcast %cst_6 : f32 to vector<16x128xf32>
    %11 = arith.mulf %10, %9 : vector<16x128xf32>
    %cst_7 = arith.constant 0.707106769 : f32
    %12 = vector.broadcast %cst_7 : f32 to vector<16x128xf32>
    %13 = arith.mulf %9, %12 : vector<16x128xf32>
    %14 = math.erf %13 : vector<16x128xf32>
    %cst_8 = arith.constant 1.000000e+00 : f32
    %15 = vector.broadcast %cst_8 : f32 to vector<16x128xf32>
    %16 = arith.addf %15, %14 : vector<16x128xf32>
    %17 = arith.mulf %11, %16 : vector<16x128xf32>
    %c0_9 = arith.constant 0 : index
    %c0_10 = arith.constant 0 : index
    %18 = vector.load %arg10[%c0_9, %c0_10] : memref<16x32xf32, #tpu.memory_space<vmem>>, vector<16x32xf32>
    %19 = arith.truncf %17 : vector<16x128xf32> to vector<16x128xbf16>
    %c0_11 = arith.constant 0 : index
    %c0_12 = arith.constant 0 : index
    %20 = vector.load %arg5[%c0_11, %c0_12] : memref<128x32xbf16, #tpu.memory_space<vmem>>, vector<128x32xbf16>
    %cst_13 = arith.constant dense<0.000000e+00> : vector<16x32xf32>
    %21 = tpu.matmul %19, %20, %cst_13 {dimension_numbers = #tpu.dot_dimension_numbers<[1], [0], [0], [1], [0, 0, 1, 1], [], []>} : vector<16x128xbf16>, vector<128x32xbf16>, vector<16x32xf32> -> vector<16x32xf32>
    %22 = arith.addf %18, %21 : vector<16x32xf32>
    %c0_14 = arith.constant 0 : index
    %c0_15 = arith.constant 0 : index
    %23 = vector.load %arg10[%c0_14, %c0_15] : memref<16x32xf32, #tpu.memory_space<vmem>>, vector<16x32xf32>
    tpu.vector_store %arg10[%c0_14, %c0_15], %22 {strides = array<i32>} : memref<16x32xf32, #tpu.memory_space<vmem>>, vector<16x32xf32>,
    %c0_i32_16 = arith.constant 0 : i32
    %24 = arith.cmpi eq, %arg1, %c0_i32_16 : i32
    %25 = arith.extui %24 : i1 to i32
    %c0_i32_17 = arith.constant 0 : i32
    %26 = arith.cmpi ne, %25, %c0_i32_17 : i32
    scf.if %26 {
      %c0_18 = arith.constant 0 : index
      %c0_19 = arith.constant 0 : index
      %27 = vector.load %arg10[%c0_18, %c0_19] : memref<16x32xf32, #tpu.memory_space<vmem>>, vector<16x32xf32>
      %c0_20 = arith.constant 0 : index
      %c0_21 = arith.constant 0 : index
      %28 = vector.load %arg6[%c0_20, %c0_21] : memref<1x32xf32, #tpu.memory_space<vmem>>, vector<1x32xf32>
      %29 = vector.broadcast %28 : vector<1x32xf32> to vector<16x32xf32>
      %30 = arith.addf %27, %29 : vector<16x32xf32>
      %31 = arith.addf %30, %3 : vector<16x32xf32>
      %cst_22 = arith.constant dense<0.000000e+00> : vector<16xf32>
      %32 = vector.multi_reduction <add>, %31, %cst_22 [1] : vector<16x32xf32> to vector<16xf32>
      %33 = vector.shape_cast %32 : vector<16xf32> to vector<16x1xf32>
      %cst_23 = arith.constant 3.200000e+01 : f32
      %34 = vector.broadcast %cst_23 : f32 to vector<16x1xf32>
      %35 = arith.divf %33, %34 : vector<16x1xf32>
      %36 = vector.broadcast %35 : vector<16x1xf32> to vector<16x32xf32>
      %37 = arith.subf %31, %36 : vector<16x32xf32>
      %38 = arith.mulf %37, %37 : vector<16x32xf32>
      %cst_24 = arith.constant dense<0.000000e+00> : vector<16xf32>
      %39 = vector.multi_reduction <add>, %38, %cst_24 [1] : vector<16x32xf32> to vector<16xf32>
      %40 = vector.shape_cast %39 : vector<16xf32> to vector<16x1xf32>
      %cst_25 = arith.constant 3.200000e+01 : f32
      %41 = vector.broadcast %cst_25 : f32 to vector<16x1xf32>
      %42 = arith.divf %40, %41 : vector<16x1xf32>
      %cst_26 = arith.constant 9.99999974E-6 : f32
      %43 = vector.broadcast %cst_26 : f32 to vector<16x1xf32>
      %44 = arith.addf %42, %43 : vector<16x1xf32>
      %45 = math.rsqrt %44 : vector<16x1xf32>
      %46 = vector.broadcast %45 : vector<16x1xf32> to vector<16x32xf32>
      %47 = arith.mulf %37, %46 : vector<16x32xf32>
      %c0_27 = arith.constant 0 : index
      %c0_28 = arith.constant 0 : index
      %48 = vector.load %arg7[%c0_27, %c0_28] : memref<1x32xf32, #tpu.memory_space<vmem>>, vector<1x32xf32>
      %49 = vector.broadcast %48 : vector<1x32xf32> to vector<16x32xf32>
      %50 = arith.mulf %47, %49 : vector<16x32xf32>
      %c0_29 = arith.constant 0 : index
      %c0_30 = arith.constant 0 : index
      %51 = vector.load %arg8[%c0_29, %c0_30] : memref<1x32xf32, #tpu.memory_space<vmem>>, vector<1x32xf32>
      %52 = vector.broadcast %51 : vector<1x32xf32> to vector<16x32xf32>
      %53 = arith.addf %50, %52 : vector<16x32xf32>
      %c0_31 = arith.constant 0 : index
      %c0_32 = arith.constant 0 : index
      %54 = vector.load %arg9[%c0_31, %c0_32] : memref<16x32xf32, #tpu.memory_space<vmem>>, vector<16x32xf32>
      tpu.vector_store %arg9[%c0_31, %c0_32], %53 {strides = array<i32>} : memref<16x32xf32, #tpu.memory_space<vmem>>, vector<16x32xf32>,
    } else {
    }
    return
  }
  func.func @transform_0(%arg0: i32, %arg1: i32) -> (i32, i32) {
    %c0_i32 = arith.constant 0 : i32
    %c0_i32_0 = arith.constant 0 : i32
    return %arg0, %c0_i32 : i32, i32
  }
  func.func @transform_1(%arg0: i32, %arg1: i32) -> (i32, i32) {
    %c0_i32 = arith.constant 0 : i32
    %c0_i32_0 = arith.constant 0 : i32
    return %c0_i32, %arg1 : i32, i32
  }
  func.func @transform_2(%arg0: i32, %arg1: i32) -> (i32, i32) {
    %c0_i32 = arith.constant 0 : i32
    %c0_i32_0 = arith.constant 0 : i32
    return %c0_i32, %arg1 : i32, i32
  }
  func.func @transform_3(%arg0: i32, %arg1: i32) -> (i32, i32) {
    %c0_i32 = arith.constant 0 : i32
    %c0_i32_0 = arith.constant 0 : i32
    return %arg1, %c0_i32 : i32, i32
  }
  func.func @transform_4(%arg0: i32, %arg1: i32) -> (i32, i32) {
    %c0_i32 = arith.constant 0 : i32
    %c0_i32_0 = arith.constant 0 : i32
    %c0_i32_1 = arith.constant 0 : i32
    return %c0_i32, %c0_i32_0 : i32, i32
  }
  func.func @transform_5(%arg0: i32, %arg1: i32) -> (i32, i32) {
    %c0_i32 = arith.constant 0 : i32
    %c0_i32_0 = arith.constant 0 : i32
    %c0_i32_1 = arith.constant 0 : i32
    return %c0_i32, %c0_i32_0 : i32, i32
  }
  func.func @transform_6(%arg0: i32, %arg1: i32) -> (i32, i32) {
    %c0_i32 = arith.constant 0 : i32
    %c0_i32_0 = arith.constant 0 : i32
    %c0_i32_1 = arith.constant 0 : i32
    return %c0_i32, %c0_i32_0 : i32, i32
  }
  func.func @transform_7(%arg0: i32, %arg1: i32) -> (i32, i32) {
    %c0_i32 = arith.constant 0 : i32
    %c0_i32_0 = arith.constant 0 : i32
    return %arg0, %c0_i32 : i32, i32
  }
}

module attributes {stable_mosaic.version = 11 : i64} {
  func.func @_ffn_kernel(%arg0: i32, %arg1: i32, %arg2: memref<16x32xf32, #tpu.memory_space<vmem>>, %arg3: memref<32x128xbf16, #tpu.memory_space<vmem>>, %arg4: memref<1x128xf32, #tpu.memory_space<vmem>>, %arg5: memref<128x32xbf16, #tpu.memory_space<vmem>>, %arg6: memref<1x32xf32, #tpu.memory_space<vmem>>, %arg7: memref<1x32xf32, #tpu.memory_space<vmem>>, %arg8: memref<1x32xf32, #tpu.memory_space<vmem>>, %arg9: memref<16x32xf32, #tpu.memory_space<vmem>>, %arg10: memref<16x32xf32, #tpu.memory_space<vmem>>) attributes {dimension_semantics = [#tpu.dimension_semantics<parallel>, #tpu.dimension_semantics<arbitrary>], iteration_bounds = array<i64: 1, 1>, scalar_prefetch = 0 : i64, scratch_operands = 1 : i64, tpu.core_type = #tpu.core_type<tc>, window_params = [{transform_indices = @transform_0, window_bounds = array<i64: 16, 32>}, {transform_indices = @transform_1, window_bounds = array<i64: 32, 128>}, {transform_indices = @transform_2, window_bounds = array<i64: 1, 128>}, {transform_indices = @transform_3, window_bounds = array<i64: 128, 32>}, {pipeline_mode = #tpu.pipeline_mode<synchronous>, transform_indices = @transform_4, window_bounds = array<i64: 1, 32>}, {pipeline_mode = #tpu.pipeline_mode<synchronous>, transform_indices = @transform_5, window_bounds = array<i64: 1, 32>}, {pipeline_mode = #tpu.pipeline_mode<synchronous>, transform_indices = @transform_6, window_bounds = array<i64: 1, 32>}, {transform_indices = @transform_7, window_bounds = array<i64: 16, 32>}]} {
    %c0_i32 = arith.constant 0 : i32
    %0 = arith.cmpi eq, %arg1, %c0_i32 : i32
    %1 = arith.extui %0 : i1 to i32
    %c0_i32_0 = arith.constant 0 : i32
    %2 = arith.cmpi ne, %1, %c0_i32_0 : i32
    scf.if %2 {
      %cst_18 = arith.constant 0.000000e+00 : f32
      %27 = vector.broadcast %cst_18 : f32 to vector<16x32xf32>
      %c0_19 = arith.constant 0 : index
      %c0_20 = arith.constant 0 : index
      %28 = vector.load %arg10[%c0_19, %c0_20] : memref<16x32xf32, #tpu.memory_space<vmem>>, vector<16x32xf32>
      tpu.vector_store %arg10[%c0_19, %c0_20], %27 {strides = array<i32>} : memref<16x32xf32, #tpu.memory_space<vmem>>, vector<16x32xf32>,
    } else {
    }
    %c0 = arith.constant 0 : index
    %c0_1 = arith.constant 0 : index
    %3 = vector.load %arg2[%c0, %c0_1] : memref<16x32xf32, #tpu.memory_space<vmem>>, vector<16x32xf32>
    %4 = arith.truncf %3 : vector<16x32xf32> to vector<16x32xbf16>
    %c0_2 = arith.constant 0 : index
    %c0_3 = arith.constant 0 : index
    %5 = vector.load %arg3[%c0_2, %c0_3] : memref<32x128xbf16, #tpu.memory_space<vmem>>, vector<32x128xbf16>
    %cst = arith.constant dense<0.000000e+00> : vector<16x128xf32>
    %6 = tpu.matmul %4, %5, %cst {dimension_numbers = #tpu.dot_dimension_numbers<[1], [0], [0], [1], [0, 0, 1, 1], [], []>} : vector<16x32xbf16>, vector<32x128xbf16>, vector<16x128xf32> -> vector<16x128xf32>
    %c0_4 = arith.constant 0 : index
    %c0_5 = arith.constant 0 : index
    %7 = vector.load %arg4[%c0_4, %c0_5] : memref<1x128xf32, #tpu.memory_space<vmem>>, vector<1x128xf32>
    %8 = vector.broadcast %7 : vector<1x128xf32> to vector<16x128xf32>
    %9 = arith.addf %6, %8 : vector<16x128xf32>
    %cst_6 = arith.constant 5.000000e-01 : f32
    %10 = vector.broadcast %cst_6 : f32 to vector<16x128xf32>
    %11 = arith.mulf %10, %9 : vector<16x128xf32>
    %cst_7 = arith.constant 0.707106769 : f32
    %12 = vector.broadcast %cst_7 : f32 to vector<16x128xf32>
    %13 = arith.mulf %9, %12 : vector<16x128xf32>
    %14 = math.erf %13 : vector<16x128xf32>
    %cst_8 = arith.constant 1.000000e+00 : f32
    %15 = vector.broadcast %cst_8 : f32 to vector<16x128xf32>
    %16 = arith.addf %15, %14 : vector<16x128xf32>
    %17 = arith.mulf %11, %16 : vector<16x128xf32>
    %c0_9 = arith.constant 0 : index
    %c0_10 = arith.constant 0 : index
    %18 = vector.load %arg10[%c0_9, %c0_10] : memref<16x32xf32, #tpu.memory_space<vmem>>, vector<16x32xf32>
    %19 = arith.truncf %17 : vector<16x128xf32> to vector<16x128xbf16>
    %c0_11 = arith.constant 0 : index
    %c0_12 = arith.constant 0 : index
    %20 = vector.load %arg5[%c0_11, %c0_12] : memref<128x32xbf16, #tpu.memory_space<vmem>>, vector<128x32xbf16>
    %cst_13 = arith.constant dense<0.000000e+00> : vector<16x32xf32>
    %21 = tpu.matmul %19, %20, %cst_13 {dimension_numbers = #tpu.dot_dimension_numbers<[1], [0], [0], [1], [0, 0, 1, 1], [], []>} : vector<16x128xbf16>, vector<128x32xbf16>, vector<16x32xf32> -> vector<16x32xf32>
    %22 = arith.addf %18, %21 : vector<16x32xf32>
    %c0_14 = arith.constant 0 : index
    %c0_15 = arith.constant 0 : index
    %23 = vector.load %arg10[%c0_14, %c0_15] : memref<16x32xf32, #tpu.memory_space<vmem>>, vector<16x32xf32>
    tpu.vector_store %arg10[%c0_14, %c0_15], %22 {strides = array<i32>} : memref<16x32xf32, #tpu.memory_space<vmem>>, vector<16x32xf32>,
    %c0_i32_16 = arith.constant 0 : i32
    %24 = arith.cmpi eq, %arg1, %c0_i32_16 : i32
    %25 = arith.extui %24 : i1 to i32
    %c0_i32_17 = arith.constant 0 : i32
    %26 = arith.cmpi ne, %25, %c0_i32_17 : i32
    scf.if %26 {
      %c0_18 = arith.constant 0 : index
      %c0_19 = arith.constant 0 : index
      %27 = vector.load %arg10[%c0_18, %c0_19] : memref<16x32xf32, #tpu.memory_space<vmem>>, vector<16x32xf32>
      %c0_20 = arith.constant 0 : index
      %c0_21 = arith.constant 0 : index
      %28 = vector.load %arg6[%c0_20, %c0_21] : memref<1x32xf32, #tpu.memory_space<vmem>>, vector<1x32xf32>
      %29 = vector.broadcast %28 : vector<1x32xf32> to vector<16x32xf32>
      %30 = arith.addf %27, %29 : vector<16x32xf32>
      %31 = arith.addf %30, %3 : vector<16x32xf32>
      %cst_22 = arith.constant dense<0.000000e+00> : vector<16xf32>
      %32 = vector.multi_reduction <add>, %31, %cst_22 [1] : vector<16x32xf32> to vector<16xf32>
      %33 = vector.shape_cast %32 : vector<16xf32> to vector<16x1xf32>
      %cst_23 = arith.constant 3.200000e+01 : f32
      %34 = vector.broadcast %cst_23 : f32 to vector<16x1xf32>
      %35 = arith.divf %33, %34 : vector<16x1xf32>
      %36 = vector.broadcast %35 : vector<16x1xf32> to vector<16x32xf32>
      %37 = arith.subf %31, %36 : vector<16x32xf32>
      %38 = arith.mulf %37, %37 : vector<16x32xf32>
      %cst_24 = arith.constant dense<0.000000e+00> : vector<16xf32>
      %39 = vector.multi_reduction <add>, %38, %cst_24 [1] : vector<16x32xf32> to vector<16xf32>
      %40 = vector.shape_cast %39 : vector<16xf32> to vector<16x1xf32>
      %cst_25 = arith.constant 3.200000e+01 : f32
      %41 = vector.broadcast %cst_25 : f32 to vector<16x1xf32>
      %42 = arith.divf %40, %41 : vector<16x1xf32>
      %cst_26 = arith.constant 9.99999974E-6 : f32
      %43 = vector.broadcast %cst_26 : f32 to vector<16x1xf32>
      %44 = arith.addf %42, %43 : vector<16x1xf32>
      %45 = math.rsqrt %44 : vector<16x1xf32>
      %46 = vector.broadcast %45 : vector<16x1xf32> to vector<16x32xf32>
      %47 = arith.mulf %37, %46 : vector<16x32xf32>
      %c0_27 = arith.constant 0 : index
      %c0_28 = arith.constant 0 : index
      %48 = vector.load %arg7[%c0_27, %c0_28] : memref<1x32xf32, #tpu.memory_space<vmem>>, vector<1x32xf32>
      %49 = vector.broadcast %48 : vector<1x32xf32> to vector<16x32xf32>
      %50 = arith.mulf %47, %49 : vector<16x32xf32>
      %c0_29 = arith.constant 0 : index
      %c0_30 = arith.constant 0 : index
      %51 = vector.load %arg8[%c0_29, %c0_30] : memref<1x32xf32, #tpu.memory_space<vmem>>, vector<1x32xf32>
      %52 = vector.broadcast %51 : vector<1x32xf32> to vector<16x32xf32>
      %53 = arith.addf %50, %52 : vector<16x32xf32>
      %c0_31 = arith.constant 0 : index
      %c0_32 = arith.constant 0 : index
      %54 = vector.load %arg9[%c0_31, %c0_32] : memref<16x32xf32, #tpu.memory_space<vmem>>, vector<16x32xf32>
      tpu.vector_store %arg9[%c0_31, %c0_32], %53 {strides = array<i32>} : memref<16x32xf32, #tpu.memory_space<vmem>>, vector<16x32xf32>,
    } else {
    }
    return
  }
  func.func @transform_0(%arg0: i32, %arg1: i32) -> (i32, i32) {
    %c0_i32 = arith.constant 0 : i32
    %c0_i32_0 = arith.constant 0 : i32
    return %arg0, %c0_i32 : i32, i32
  }
  func.func @transform_1(%arg0: i32, %arg1: i32) -> (i32, i32) {
    %c0_i32 = arith.constant 0 : i32
    %c0_i32_0 = arith.constant 0 : i32
    return %c0_i32, %arg1 : i32, i32
  }
  func.func @transform_2(%arg0: i32, %arg1: i32) -> (i32, i32) {
    %c0_i32 = arith.constant 0 : i32
    %c0_i32_0 = arith.constant 0 : i32
    return %c0_i32, %arg1 : i32, i32
  }
  func.func @transform_3(%arg0: i32, %arg1: i32) -> (i32, i32) {
    %c0_i32 = arith.constant 0 : i32
    %c0_i32_0 = arith.constant 0 : i32
    return %arg1, %c0_i32 : i32, i32
  }
  func.func @transform_4(%arg0: i32, %arg1: i32) -> (i32, i32) {
    %c0_i32 = arith.constant 0 : i32
    %c0_i32_0 = arith.constant 0 : i32
    %c0_i32_1 = arith.constant 0 : i32
    return %c0_i32, %c0_i32_0 : i32, i32
  }
  func.func @transform_5(%arg0: i32, %arg1: i32) -> (i32, i32) {
    %c0_i32 = arith.constant 0 : i32
    %c0_i32_0 = arith.constant 0 : i32
    %c0_i32_1 = arith.constant 0 : i32
    return %c0_i32, %c0_i32_0 : i32, i32
  }
  func.func @transform_6(%arg0: i32, %arg1: i32) -> (i32, i32) {
    %c0_i32 = arith.constant 0 : i32
    %c0_i32_0 = arith.constant 0 : i32
    %c0_i32_1 = arith.constant 0 : i32
    return %c0_i32, %c0_i32_0 : i32, i32
  }
  func.func @transform_7(%arg0: i32, %arg1: i32) -> (i32, i32) {
    %c0_i32 = arith.constant 0 : i32
    %c0_i32_0 = arith.constant 0 : i32
    return %arg0, %c0_i32 : i32, i32
  }
}

</mosaic_0001>

<bundles_post_ra>
// kernel: transformer_encoder.6
= control target key start
LH: loop header
LB: loop body
LE: loop exit
PB: predicated region body
PF: predicated region fallthrough
CT: control target
= control target key end

     0   :  { %vm41_vm0 = vcmask 261120   ;;  %vm61_vm1 = vcmask 257024   ;;  %s109_s29 = smov 80   ;;  %s110_s30 = smov 96   ;;  %vm72_vm2 = vcmask 125952   ;;  %s174_s1 = inlined_call_operand.vmem [shape: bf16[32,64], index: 1, kind: input, shape index: {}]   ;;  %s175_s0 = inlined_call_operand.vmem [shape: f32[16,32], index: 0, kind: input, shape index: {}]   ;;  %s176_s2 = inlined_call_operand.vmem [shape: f32[1,64], index: 2, kind: input, shape index: {}]   ;;  %s177_s3 = inlined_call_operand.vmem [shape: bf16[16,32], index: 3, kind: output, shape index: {0}]   ;;  %s178_s5 = inlined_call_operand.vmem [shape: bf16[16,16], index: 5, kind: output, shape index: {2}]   ;;  %s179_s4 = inlined_call_operand.vmem [shape: bf16[16,16], index: 4, kind: output, shape index: {1}]  }
   0x1   :  { %v105_v0 = vld [vmem:[%s174_s1 + $0x8] sm:$0xff]  ;;  %v104_v1 = vld [vmem:[%s174_s1] sm:$0xff] }
   0x2   :  { %51 = vmatpush.bf16.msra.mxu0 %v105_v0  ;;  %v18_v2 = vld [vmem:[%s175_s0] sm:$0xff]  ;;  %v19_v3 = vld [vmem:[%s175_s0 + $0x8] sm:$0xff] }
   0x3   :  { %v20_v4 = vpack.c.bf16 %v19_v3, %v18_v2  ;;  %v108_v5 = vld [vmem:[%s176_s2] ss:$0 sm:$0xff] }
   0x6   :  { %52 = vmatpush.bf16.msra.mxu0 %v104_v1 }
   0x9   :  { %103 = vmatmul.msk.bf16.vlgmr.msra.gmra.mxu0 %vm41_vm0, %v20_v4 }
  0x86   :  { %v54_v6 = vpop.f32.mrf.mxu0 }
  0x87   :  { %v55_v7 = vadd.f32 %v108_v5, %v54_v6 }
  0x89   :  { %v59_v8 = vpack.c.bf16 %v55_v7, %v55_v7 }
  0x8b   :  { %62 = vst.msk [vmem:[%s177_s3] sm:$0xf] %vm61_vm1, %v59_v8  ;;  %75 = vrot.lane.b32.xlu1 %v59_v8, %s109_s29  ;;  %66 = vrot.lane.b32.xlu0 %v59_v8, %s110_s30 }
  0x8e   :  { %v56_v9 = vpop.f32.mrf.mxu0 }
  0x8f   :  { %v57_v10 = vadd.f32 %v108_v5, %v56_v9 }
  0x91   :  { %v60_v11 = vpack.c.bf16 %v57_v10, %v57_v10 }
  0x93   :  { %63 = vst.msk [vmem:[%s177_s3 + $0x4] sm:$0xf] %vm61_vm1, %v60_v11  ;;  %77 = vrot.lane.b32.xlu1 %v60_v11, %s109_s29  ;;  %68 = vrot.lane.b32.xlu0 %v60_v11, %s110_s30 }
  0xfd   :  { %v76_v12 = vpop.permute.xlu1 %75  ;;  %v67_v13 = vpop.permute.xlu0 %66 }
  0xfe   :  { %81 = vst.msk [vmem:[%s178_s5] sm:$0xf] %vm72_vm2, %v76_v12 }
  0xff   :  { %73 = vst.msk [vmem:[%s179_s4] sm:$0xf] %vm72_vm2, %v67_v13 }
 0x105   :  { %v78_v14 = vpop.permute.xlu1 %77  ;;  %v69_v15 = vpop.permute.xlu0 %68 }
 0x106   :  { %82 = vst.msk [vmem:[%s178_s5 + $0x4] sm:$0xf] %vm72_vm2, %v78_v14 }
 0x107   :  { %74 = vst.msk [vmem:[%s179_s4 + $0x4] sm:$0xf] %vm72_vm2, %v69_v15 }

// kernel: transformer_encoder.8
= control target key start
LH: loop header
LB: loop body
LE: loop exit
PB: predicated region body
PF: predicated region fallthrough
CT: control target
= control target key end

     0   :  { %vm31_vm0 = vcmask 261120   ;;  %v399_v56 = vmov 0.0   ;;  %s532_s1 = inlined_call_operand.vmem [shape: bf16[32,128], index: 1, kind: input, shape index: {}]   ;;  %s533_s0 = inlined_call_operand.vmem [shape: f32[16,32], index: 0, kind: input, shape index: {}]   ;;  %s534_s2 = inlined_call_operand.vmem [shape: f32[1,128], index: 2, kind: input, shape index: {}]   ;;  %s535_s3 = inlined_call_operand.vmem [shape: bf16[128,32], index: 3, kind: input, shape index: {}]   ;;  %s536_s4 = inlined_call_operand.vmem [shape: f32[1,32], index: 4, kind: input, shape index: {}]   ;;  %s537_s5 = inlined_call_operand.vmem [shape: f32[1,32], index: 5, kind: input, shape index: {}]   ;;  %s538_s6 = inlined_call_operand.vmem [shape: f32[1,32], index: 6, kind: input, shape index: {}]   ;;  %s539_s7 = inlined_call_operand.vmem [shape: f32[16,32], index: 7, kind: output, shape index: {}]  }
   0x1   :  { %v374_v0 = vld [vmem:[%s532_s1 + $0x8] sm:$0xff]  ;;  %v373_v1 = vld [vmem:[%s532_s1] sm:$0xff]  ;;  %v382_v6 = vld [vmem:[%s535_s3 + $0x38] sm:$0xff]  ;;  %32 = vst.msk [vmem:[#allocation2] sm:$0xff] %vm31_vm0, %v399_v56 }
   0x2   :  { %67 = vmatpush.bf16.msra.mxu0 %v374_v0  ;;  %v450_v2 = vld [vmem:[%s533_s0] sm:$0xff]  ;;  %v455_v3 = vld [vmem:[%s533_s0 + $0x8] sm:$0xff]  ;;  %230 = vmatpush.bf16.msra.mxu1 %v382_v6  ;;  %v381_v10 = vld [vmem:[%s535_s3 + $0x30] sm:$0xff]  ;;  %33 = vst.msk [vmem:[#allocation2 + $0x8] sm:$0xff] %vm31_vm0, %v399_v56 }
   0x3   :  { %v36_v4 = vpack.c.bf16 %v455_v3, %v450_v2  ;;  %v385_v5 = vld [vmem:[%s534_s2] ss:$0 sm:$0xff]  ;;  %v380_v12 = vld [vmem:[%s535_s3 + $0x28] sm:$0xff]  ;;  %v378_v23 = vld [vmem:[%s535_s3 + $0x18] sm:$0xff] }
   0x4   :  { %v379_v17 = vld [vmem:[%s535_s3 + $0x20] sm:$0xff]  ;;  %v377_v29 = vld [vmem:[%s535_s3 + $0x10] sm:$0xff]  ;;  %v376_v37 = vld [vmem:[%s535_s3 + $0x8] sm:$0xff] }
   0x5   :  { %v375_v44 = vld [vmem:[%s535_s3] sm:$0xff] }
   0x6   :  { %68 = vmatpush.bf16.msra.mxu0 %v373_v1  ;;  %231 = vmatpush.bf16.msra.mxu1 %v381_v10 }
   0x9   :  { %338 = vmatmul.msk.bf16.vlgmr.msra.gmra.mxu0 %vm31_vm0, %v36_v4 }
   0xa   :  { %232 = vmatpush.bf16.msra.mxu1 %v380_v12 }
   0xe   :  { %233 = vmatpush.bf16.msra.mxu1 %v379_v17 }
  0x12   :  { %234 = vmatpush.bf16.msra.mxu1 %v378_v23 }
  0x16   :  { %235 = vmatpush.bf16.msra.mxu1 %v377_v29 }
  0x1a   :  { %236 = vmatpush.bf16.msra.mxu1 %v376_v37 }
  0x1e   :  { %237 = vmatpush.bf16.msra.mxu1 %v375_v44 }
  0x86   :  { %v70_v7 = vpop.f32.mrf.mxu0 }
  0x87   :  { %v466_v8 = vadd.f32 %v385_v5, %v70_v7 }
  0x89   :  { %v469_v9 = vmul.f32 0.70710677, %v466_v8 }
  0x8b   :  { %v79_v11 = vmul.f32 %v469_v9, %v469_v9 }
  0x8d   :  { %v80_v13 = vmin.f32 %v79_v11, 16.0 }
  0x8e   :  { %v72_v14 = vpop.f32.mrf.mxu0 }
  0x8f   :  { %v81_v15 = vmul.f32 2.1237322e-06, %v80_v13  ;;  %v479_v16 = vadd.f32 %v385_v5, %v72_v14  ;;  %v92_v18 = vmul.f32 3.8918573e-05, %v80_v13 }
  0x91   :  { %v82_v19 = vadd.f32 0.00028619796, %v81_v15  ;;  %v485_v20 = vmul.f32 0.70710677, %v479_v16  ;;  %v93_v21 = vadd.f32 0.001143296, %v92_v18 }
  0x93   :  { %v119_v22 = vmul.f32 %v485_v20, %v485_v20  ;;  %v83_v24 = vmul.f32 %v82_v19, %v80_v13  ;;  %v94_v25 = vmul.f32 %v93_v21, %v80_v13 }
  0x95   :  { %v120_v26 = vmin.f32 %v119_v22, 16.0  ;;  %v95_v27 = vadd.f32 0.014752088, %v94_v25  ;;  %v84_v31 = vadd.f32 0.0036580483, %v83_v24 }
  0x97   :  { %v121_v28 = vmul.f32 2.1237322e-06, %v120_v26  ;;  %v132_v30 = vmul.f32 3.8918573e-05, %v120_v26  ;;  %v96_v32 = vmul.f32 %v95_v27, %v80_v13  ;;  %v85_v39 = vmul.f32 %v84_v31, %v80_v13 }
  0x99   :  { %v122_v33 = vadd.f32 0.00028619796, %v121_v28  ;;  %v133_v34 = vadd.f32 0.001143296, %v132_v30  ;;  %v97_v35 = vadd.f32 0.112945676, %v96_v32 }
  0x9a   :  { %v86_v46 = vadd.f32 0.05243302, %v85_v39  ;;  %v163_v39 = vld [vmem:[#allocation2] sm:$0xff] }
  0x9b   :  { %v123_v36 = vmul.f32 %v122_v33, %v120_v26  ;;  %v134_v38 = vmul.f32 %v133_v34, %v120_v26  ;;  %v98_v40 = vmul.f32 %v97_v35, %v80_v13  ;;  %v75_v33 = vmul.f32 0.5, %v466_v8 }
  0x9c   :  { %v87_v52 = vmul.f32 %v86_v46, %v80_v13  ;;  %v76_v34 = vmul.f32 0.5, %v479_v16 }
  0x9d   :  { %v124_v41 = vadd.f32 0.0036580483, %v123_v36  ;;  %v135_v42 = vadd.f32 0.014752088, %v134_v38  ;;  %v99_v43 = vadd.f32 0.4994258, %v98_v40 }
  0x9e   :  { %v88_v57 = vadd.f32 0.18741608, %v87_v52 }
  0x9f   :  { %v136_v45 = vmul.f32 %v135_v42, %v120_v26  ;;  %v100_v47 = vmul.f32 %v99_v43, %v80_v13  ;;  %v125_v48 = vmul.f32 %v124_v41, %v120_v26  ;;  %v386_v42 = vld [vmem:[%s536_s4] ss:$0 sm:$0xff] }
  0xa0   :  { %v89_v62 = vmul.f32 %v88_v57, %v80_v13 }
  0xa1   :  { %v137_v49 = vadd.f32 0.112945676, %v136_v45  ;;  %v101_v50 = vadd.f32 1.0, %v100_v47  ;;  %v126_v53 = vadd.f32 0.05243302, %v125_v48 }
  0xa2   :  { %v90_v6 = vadd.f32 1.1283791, %v89_v62 }
  0xa3   :  { %v138_v51 = vmul.f32 %v137_v49, %v120_v26  ;;  %389 = vrcp.f32 %v101_v50  ;;  %v127_v58 = vmul.f32 %v126_v53, %v120_v26  ;;  %v113_v1 = vand.u32 2147483648, %v101_v50 }
  0xa4   :  { %v111_v5 = vand.u32 2147483647, %v101_v50  ;;  %vm107_vm2 = vweird.f32 %v101_v50  ;;  %v91_v17 = vmul.f32 %v90_v6, %v469_v9 }
  0xa5   :  { %v139_v54 = vadd.f32 0.4994258, %v138_v51  ;;  %v128_v63 = vadd.f32 0.18741608, %v127_v58  ;;  %v114_v12 = vor.u32 1.1754944e-38, %v113_v1  ;;  %v400_v51 = vmov 32.0  }
  0xa6   :  { %vm112_vm4 = vcmp.eq.f32.partialorder %v111_v5, 8.507059e+37 }
  0xa7   :  { %v140_v55 = vmul.f32 %v139_v54, %v120_v26  ;;  %v129_v10 = vmul.f32 %v128_v63, %v120_v26 }
  0xa9   :  { %v141_v59 = vadd.f32 1.0, %v140_v55  ;;  %v390_v60 = vpop.eup %389  ;;  %v130_v19 = vadd.f32 1.1283791, %v129_v10 }
  0xaa   :  { %v103_v61 = vmul.f32 %v390_v60, %v101_v50  ;;  %vm108_vm1 = vweird.f32 %v390_v60 }
  0xab   :  { %391 = vrcp.f32 %v141_v59  ;;  %vm109_vm3 = vmor %vm107_vm2, %vm108_vm1  ;;  %v153_v21 = vand.u32 2147483648, %v141_v59  ;;  %v151_v24 = vand.u32 2147483647, %v141_v59  ;;  %vm147_vm6 = vweird.f32 %v141_v59 }
  0xac   :  { %v104_v0 = vsub.f32 1.0, %v103_v61  ;;  %v131_v27 = vmul.f32 %v130_v19, %v485_v20  ;;  %v164_v20 = vld [vmem:[#allocation2 + $0x8] sm:$0xff]  ;;  %393 = vrcp.f32 %v400_v51 }
  0xad   :  { %v154_v26 = vor.u32 1.1754944e-38, %v153_v21  ;;  %vm152_vm8 = vcmp.eq.f32.partialorder %v151_v24, 8.507059e+37 }
  0xae   :  { %v105_v4 = vmul.f32 %v390_v60, %v104_v0 }
  0xb0   :  { %v106_v11 = vadd.f32 %v390_v60, %v105_v4 }
  0xb1   :  { %v392_v7 = vpop.eup %391 }
  0xb2   :  { %v143_v14 = vmul.f32 %v392_v7, %v141_v59  ;;  %v110_v15 = vsel %vm109_vm3, %v390_v60, %v106_v11  ;;  %vm148_vm5 = vweird.f32 %v392_v7  ;;  %v394_v52 = vpop.eup %393 }
  0xb3   :  { %v115_v18 = vsel %vm112_vm4, %v114_v12, %v110_v15  ;;  %vm149_vm7 = vmor %vm147_vm6, %vm148_vm5  ;;  %v268_v53 = vmul.f32 32.0, %v394_v52  ;;  %vm272_vm9 = vweird.f32 %v394_v52 }
  0xb4   :  { %v144_v13 = vsub.f32 1.0, %v143_v14  ;;  %v116_v22 = vmul.f32 %v115_v18, %v91_v17 }
  0xb5   :  { %v269_v54 = vsub.f32 1.0, %v268_v53 }
  0xb6   :  { %v145_v23 = vmul.f32 %v392_v7, %v144_v13  ;;  %v339_v28 = vclamps-f32 %v116_v22, 1.0  ;;  %v387_v22 = vld [vmem:[%s537_s5] ss:$0 sm:$0xff] }
  0xb7   :  { %v270_v55 = vmul.f32 %v394_v52, %v269_v54 }
  0xb8   :  { %v146_v25 = vadd.f32 %v392_v7, %v145_v23  ;;  %v159_v32 = vadd.f32 1.0, %v339_v28 }
  0xb9   :  { %v271_v56 = vadd.f32 %v394_v52, %v270_v55 }
  0xba   :  { %v150_v29 = vsel %vm149_vm7, %v392_v7, %v146_v25  ;;  %v161_v36 = vmul.f32 %v159_v32, %v75_v33  ;;  %v388_v25 = vld [vmem:[%s538_s6] ss:$0 sm:$0xff] }
  0xbb   :  { %v155_v30 = vsel %vm152_vm8, %v154_v26, %v150_v29  ;;  %v273_v57 = vsel %vm272_vm9, %v394_v52, %v271_v56 }
  0xbc   :  { %v156_v31 = vmul.f32 %v155_v30, %v131_v27 }
  0xbe   :  { %v340_v9 = vclamps-f32 %v156_v31, 1.0 }
  0xc0   :  { %v160_v35 = vadd.f32 1.0, %v340_v9 }
  0xc2   :  { %v162_v37 = vmul.f32 %v160_v35, %v76_v34 }
  0xc4   :  { %v165_v38 = vpack.c.bf16 %v162_v37, %v161_v36 }
  0xc6   :  { %238 = vmatmul.bf16.vlgmr.msra.gmra.mxu1 %v165_v38 }
 0x143   :  { %v239_v40 = vpop.f32.mrf.mxu1 }
 0x144   :  { %v244_v41 = vadd.f32 %v239_v40, %v163_v39 }
 0x146   :  { %246 = vst.msk [vmem:[#allocation2] sm:$0xff] %vm31_vm0, %v244_v41 }
 0x14b   :  { %v241_v43 = vpop.f32.mrf.mxu1 }
 0x14c   :  { %v245_v44 = vadd.f32 %v241_v43, %v164_v20 }
 0x14d   :  { %v251_v8 = vld [vmem:[#allocation2] sm:$0xff] }
 0x14e   :  { %247 = vst.msk [vmem:[#allocation2 + $0x8] sm:$0xff] %vm31_vm0, %v245_v44  ;;  %v257_v16 = vadd.f32 %v386_v42, %v251_v8 }
 0x150   :  { %v259_v45 = vadd.f32 %v257_v16, %v450_v2 }
 0x152   :  { %v261_v46 = vsel %vm31_vm0, %v259_v45, 0.0 }
 0x153   :  { %262 = vadd.xlane.f32.xlu0 %v261_v46 }
 0x155   :  { %v252_v47 = vld [vmem:[#allocation2 + $0x8] sm:$0xff] }
 0x156   :  { %v258_v48 = vadd.f32 %v386_v42, %v252_v47 }
 0x158   :  { %v260_v49 = vadd.f32 %v258_v48, %v455_v3 }
 0x15a   :  { %v264_v50 = vsel %vm31_vm0, %v260_v49, 0.0 }
 0x15b   :  { %265 = vadd.xlane.f32.xlu0 %v264_v50 }
 0x1c6   :  { %v263_v2 = vpop.xlane.xlu0 %262 }
 0x1c7   :  { %v274_v58 = vmul.f32 %v273_v57, %v263_v2 }
 0x1c9   :  { %v276_v59 = vsub.f32 %v259_v45, %v274_v58 }
 0x1cb   :  { %v278_v60 = vmul.f32 %v276_v59, %v276_v59 }
 0x1cd   :  { %v280_v61 = vsel %vm31_vm0, %v278_v60, 0.0 }
 0x1ce   :  { %281 = vadd.xlane.f32.xlu1 %v280_v61  ;;  %v266_v3 = vpop.xlane.xlu0 %265 }
 0x1cf   :  { %v275_v62 = vmul.f32 %v273_v57, %v266_v3 }
 0x1d1   :  { %v277_v63 = vsub.f32 %v260_v49, %v275_v62 }
 0x1d3   :  { %v279_v0 = vmul.f32 %v277_v63, %v277_v63 }
 0x1d5   :  { %v283_v1 = vsel %vm31_vm0, %v279_v0, 0.0 }
 0x1d6   :  { %284 = vadd.xlane.f32.xlu1 %v283_v1 }
 0x241   :  { %v282_v4 = vpop.xlane.xlu1 %281 }
 0x242   :  { %v286_v5 = vmul.f32 %v282_v4, %v273_v57 }
 0x244   :  { %v288_v6 = vadd.f32 1e-05, %v286_v5 }
 0x246   :  { %395 = vrsqrt.f32 %v288_v6  ;;  %vm296_vm11 = vweird.f32 %v288_v6 }
 0x249   :  { %v285_v7 = vpop.xlane.xlu1 %284 }
 0x24a   :  { %v287_v10 = vmul.f32 %v285_v7, %v273_v57 }
 0x24c   :  { %v396_v11 = vpop.eup %395  ;;  %v289_v12 = vadd.f32 1e-05, %v287_v10 }
 0x24d   :  { %v291_v14 = vmul.f32 %v396_v11, %v288_v6  ;;  %vm297_vm10 = vweird.f32 %v396_v11 }
 0x24e   :  { %397 = vrsqrt.f32 %v289_v12  ;;  %vm298_vm12 = vmor %vm296_vm11, %vm297_vm10  ;;  %vm306_vm14 = vweird.f32 %v289_v12 }
 0x24f   :  { %v292_v15 = vmul.f32 %v396_v11, %v291_v14 }
 0x251   :  { %v293_v17 = vmul.f32 0.5, %v292_v15 }
 0x253   :  { %v294_v18 = vsub.f32 1.5, %v293_v17 }
 0x254   :  { %v398_v13 = vpop.eup %397 }
 0x255   :  { %v295_v19 = vmul.f32 %v396_v11, %v294_v18  ;;  %v301_v21 = vmul.f32 %v398_v13, %v289_v12  ;;  %vm307_vm13 = vweird.f32 %v398_v13 }
 0x256   :  { %vm308_vm15 = vmor %vm306_vm14, %vm307_vm13 }
 0x257   :  { %v299_v23 = vsel %vm298_vm12, %v396_v11, %v295_v19  ;;  %v302_v24 = vmul.f32 %v398_v13, %v301_v21 }
 0x258   :  { %v310_v26 = vmul.f32 %v299_v23, %v276_v59 }
 0x259   :  { %v303_v27 = vmul.f32 0.5, %v302_v24 }
 0x25a   :  { %v316_v28 = vmul.f32 %v387_v22, %v310_v26 }
 0x25b   :  { %v304_v29 = vsub.f32 1.5, %v303_v27 }
 0x25c   :  { %v322_v30 = vadd.f32 %v388_v25, %v316_v28 }
 0x25d   :  { %v305_v31 = vmul.f32 %v398_v13, %v304_v29 }
 0x25e   :  { %324 = vst.msk [vmem:[%s539_s7] sm:$0xff] %vm31_vm0, %v322_v30 }
 0x25f   :  { %v309_v9 = vsel %vm308_vm15, %v398_v13, %v305_v31 }
 0x260   :  { %v311_v32 = vmul.f32 %v309_v9, %v277_v63 }
 0x262   :  { %v317_v33 = vmul.f32 %v387_v22, %v311_v32 }
 0x264   :  { %v323_v34 = vadd.f32 %v388_v25, %v317_v33 }
 0x266   :  { %325 = vst.msk [vmem:[%s539_s7 + $0x8] sm:$0xff] %vm31_vm0, %v323_v34 }

// kernel: transformer_encoder.7
= control target key start
LH: loop header
LB: loop body
LE: loop exit
PB: predicated region body
PF: predicated region fallthrough
CT: control target
= control target key end

     0   :  { %s1065_s30 = smov 0   ;;  %s1067_s10 = smov 0   ;;  %s1177_s0 = inlined_call_operand.vmem [shape: bf16[2,8,32], index: 0, kind: input, shape index: {}]   ;;  %s1178_s1 = inlined_call_operand.vmem [shape: bf16[2,8,16], index: 1, kind: input, shape index: {}]   ;;  %s1179_s2 = inlined_call_operand.vmem [shape: bf16[2,8,16], index: 2, kind: input, shape index: {}]   ;;  %s1180_s3 = inlined_call_operand.vmem [shape: f32[2,1,8], index: 3, kind: input, shape index: {}]   ;;  %s1181_s4 = inlined_call_operand.vmem [shape: f32[2,8,32], index: 4, kind: input, shape index: {}]   ;;  %s1182_s5 = inlined_call_operand.vmem [shape: bf16[32,32], index: 5, kind: input, shape index: {}]   ;;  %s1183_s6 = inlined_call_operand.vmem [shape: f32[1,32], index: 6, kind: input, shape index: {}]   ;;  %s1184_s7 = inlined_call_operand.vmem [shape: f32[1,32], index: 7, kind: input, shape index: {}]   ;;  %s1185_s8 = inlined_call_operand.vmem [shape: f32[1,32], index: 8, kind: input, shape index: {}]   ;;  %s1186_s9 = inlined_call_operand.vmem [shape: f32[2,8,32], index: 9, kind: output, shape index: {}]  }
   0x1   :  { %s1069_s11 = smov 0  }
   0x2 LB: > { %s31_s12 = sadd.s32 1, %s1002_s10  ;;  %p902_p0 = scmp.ge.s32.totalorder %s1006_s11, 1  ;;  %s1006_s11 = sphi %s1069_s11, %s19_s11   ;;  %s1002_s10 = sphi %s1067_s10, %s1188_s10   ;;  %s998_s30 = sphi %s1065_s30, %s1187_s30  }
   0x3   : > { %p33_p1 = scmp.ge.s32.totalorder %s31_s12, 2  ;;  %p345_p2 = scmp.lt.s32.totalorder %s1006_s11, 3 }
   0x5   : > { %s1190_s12 = smov (%p33_p1, %s31_s12), 0  ;;  %p346_p3 = pnand %p902_p0, %p345_p2 }
   0x6   : > { %p403_p4 = scmp.lt.s32.totalorder (!%p346_p3), %s998_s30, 1  ;;  %s1008_s20 = smov (!%p346_p3), 120  }
   0x7   : > { %349 = sbr.rel (%p346_p3) target bundleno = 1478 (0x5c6), region = 56  ;;  %s1009_s21 = smov (!%p346_p3), 112  }
   0x8   : > { %s1010_s25 = smov (!%p346_p3), 104   ;;  %s1011_s29 = smov (!%p346_p3), 8  }
   0x9   : > { %s1012_s17 = smov (!%p346_p3), 24   ;;  %s1013_s18 = smov (!%p346_p3), 16  }
   0xc   : > { %s1192_s30 = smov (!%p403_p4, %s998_s30), 1  ;;  %vm443_vm0 = vcmask 64512   ;;  %vm480_vm1 = vcmask 1043456   ;;  %vm682_vm2 = vcmask 130048   ;;  %vm685_vm3 = vcmask 195584  }
   0xd   : > { %s1086_s13 = sshll.u32 %s1192_s30, 2  ;;  %s420_s24 = scalar_lea.vmem %s1180_s3, %s1192_s30  ;;  %vm708_vm4 = vcmask 261120  }
   0xe   : > { %s413_s16 = scalar_lea.vmem %s1178_s1, %s1086_s13  ;;  %s409_s19 = scalar_lea.vmem %s1177_s0, %s1086_s13  ;;  %v1106_v11 = vld [vmem:[%s420_s24] ss:$0 sm:$0xff] }
   0xf   : > { %v437_v0 = vld [vmem:[%s413_s16] sm:$0xf]  ;;  %s417_s28 = scalar_lea.vmem %s1179_s2, %s1086_s13 }
  0x10   : > { %v436_v1 = vld [vmem:[%s409_s19] sm:$0xf]  ;;  %v448_v2 = vsel %vm443_vm0, %v437_v0, 0  ;;  %v553_v5 = vunpack.c.l.b16 %v437_v0  ;;  %s906_s19 = sshll.u32 %s1192_s30, 3 }
  0x11   : > { %v499_v3 = vunpack.c.l.b16 %v436_v1  ;;  %457 = vmatpush.bf16.xpose.msra.mxu0 %v448_v2  ;;  %513 = vmatpush.bf16.xpose.msra.mxu2 %v448_v2  ;;  %v438_v33 = vld [vmem:[%s417_s28] sm:$0xf]  ;;  %s427_s24 = scalar_lea.vmem %s1181_s4, %s906_s19  ;;  %s434_s14 = scalar_lea.vmem %s1186_s9, %s906_s19 }
  0x12   : > { %v554_v6 = vpack.c.b16 %v553_v5, %v553_v5  ;;  %v482_v34 = vsel %vm480_vm1, %v438_v33, 0 }
  0x13   : > { %v500_v4 = vpack.c.b16 %v499_v3, %v499_v3  ;;  %491 = vmatpush.bf16.msra.mxu1 %v482_v34  ;;  %543 = vmatpush.bf16.msra.mxu3 %v482_v34 }
  0x15   : > { %501 = vrot.lane.b32.xlu1 %v500_v4, %s1008_s20  ;;  %550 = vrot.lane.b32.xlu2 %v500_v4, %s1009_s21 }
  0x18   : > { %908 = vmatmul.msk.bf16.vlgmr.msra.gmra.mxu0 %vm443_vm0, %v436_v1 }
  0x1d   : > { %555 = vrot.lane.b32.xlu1 %v554_v6, %s1008_s20  ;;  %615 = vrot.lane.b32.xlu2 %v500_v4, %s1010_s25  ;;  %v591_v6 = vunpack.c.l.b16 %v438_v33 }
  0x6f   : > { %v551_v8 = vpop.permute.xlu2 %550 }
  0x77   : > { %v616_v12 = vpop.permute.xlu2 %615 }
  0x87   : > { %v502_v7 = vpop.permute.xlu1 %501 }
  0x88   : > { %910 = vmatmul.msk.bf16.vlgmr.msra.gmra.mxu2 %vm443_vm0, %v502_v7  ;;  %v592_v7 = vpack.c.b16 %v591_v6, %v591_v6 }
  0x8f   : > { %v556_v9 = vpop.permute.xlu1 %555 }
  0x90   : > { %v561_v10 = vsel %vm443_vm0, %v556_v9, 0 }
  0x91   : > { %627 = vmatpush.bf16.xpose.msrb.mxu0 %v561_v10  ;;  %570 = vmatpush.bf16.xpose.msrb.mxu1 %v561_v10 }
  0x95   : > { %v459_v13 = vpop.f32.mrf.mxu0 }
  0x96   : > { %v463_v14 = vmul.f32 0.35355338, %v459_v13 }
  0x98   : > { %914 = vmatmul.msk.bf16.vlgmr.msrb.gmra.mxu0 %vm443_vm0, %v616_v12  ;;  %v464_v15 = vadd.f32 %v1106_v11, %v463_v14 }
  0x9a   : > { %v465_v16 = vsel %vm443_vm0, %v464_v15, -inf }
  0x9b   : > { %466 = vmax.xlane.f32.xlu0 %v465_v16 }
  0x9d   : > { %v461_v17 = vpop.f32.mrf.mxu0 }
 0x10b   : > { %v515_v18 = vpop.f32.mrf.mxu2 }
 0x10c   : > { %v519_v26 = vmul.f32 0.35355338, %v515_v18  ;;  %v928_v18 = vld [vmem:[%s1182_s5 + $0x8] sm:$0xff] }
 0x10e   : > { %v467_v19 = vpop.xlane.xlu0 %466  ;;  %v520_v30 = vadd.f32 %v1106_v11, %v519_v26 }
 0x10f   : > { %v468_v20 = vsub.f32 %v464_v15, %v467_v19  ;;  %v927_v19 = vld [vmem:[%s1182_s5] sm:$0xff] }
 0x110   : > { %v521_v32 = vsel %vm443_vm0, %v520_v30, -inf }
 0x111   : > { %v469_v21 = vmul.f32 1.442695, %v468_v20 }
 0x113   : > { %v517_v22 = vpop.f32.mrf.mxu2  ;;  %964 = vpow2.f32 %v469_v21 }
 0x115   : > { %v629_v23 = vpop.f32.mrf.mxu0 }
 0x116   : > { %v633_v24 = vmul.f32 0.35355338, %v629_v23 }
 0x118   : > { %v634_v25 = vadd.f32 %v1106_v11, %v633_v24 }
 0x119   : > { %v965_v27 = vpop.eup %964 }
 0x11a   : > { %v635_v28 = vsel %vm443_vm0, %v634_v25, -inf  ;;  %v471_v29 = vsel %vm443_vm0, %v965_v27, 0.0 }
 0x11b   : > { %636 = vmax.xlane.f32.xlu2 %v635_v28  ;;  %472 = vadd.xlane.f32.xlu0 %v471_v29 }
 0x11d   : > { %v631_v31 = vpop.f32.mrf.mxu0 }
 0x123   : > { %522 = vmax.xlane.f32.xlu0 %v521_v32 }
 0x18e   : > { %v473_v35 = vpop.xlane.xlu0 %472  ;;  %v637_v36 = vpop.xlane.xlu2 %636 }
 0x18f   : > { %966 = vrcp.f32 %v473_v35  ;;  %v638_v41 = vsub.f32 %v634_v25, %v637_v36 }
 0x191   : > { %v639_v44 = vmul.f32 1.442695, %v638_v41 }
 0x195   : > { %v967_v37 = vpop.eup %966 }
 0x196   : > { %v523_v38 = vpop.xlane.xlu0 %522  ;;  %v475_v39 = vmul.f32 %v967_v37, %v965_v27  ;;  %v961_v37 = vld [vmem:[%s1183_s6] ss:$0 sm:$0xff] }
 0x197   : > { %v524_v40 = vsub.f32 %v520_v30, %v523_v38 }
 0x198   : > { %v476_v42 = vpack.c.bf16 %v475_v39, %v475_v39  ;;  %v724_v39 = vld [vmem:[%s427_s24] sm:$0xff] }
 0x199   : > { %v525_v43 = vmul.f32 1.442695, %v524_v40 }
 0x19a   : > { %909 = vmatmul.msk.bf16.vlgmr.msra.gmra.mxu1 %vm443_vm0, %v476_v42 }
 0x19b   : > { %968 = vpow2.f32 %v525_v43  ;;  %717 = vmatpush.bf16.msra.mxu1 %v928_v18 }
 0x19c   : > { %970 = vpow2.f32 %v639_v44  ;;  %v1014_v44 = vmov 32.0  }
 0x19f   : > { %718 = vmatpush.bf16.msra.mxu1 %v927_v19 }
 0x1a1   : > { %v969_v45 = vpop.eup %968 }
 0x1a2   : > { %v527_v46 = vsel %vm443_vm0, %v969_v45, 0.0  ;;  %v971_v47 = vpop.eup %970 }
 0x1a3   : > { %528 = vadd.xlane.f32.xlu0 %v527_v46  ;;  %v641_v48 = vsel %vm443_vm0, %v971_v47, 0.0 }
 0x1aa   : > { %912 = vmatmul.msk.bf16.vlgmr.msrb.gmra.mxu1 %vm443_vm0, %v551_v8 }
 0x1ab   : > { %642 = vadd.xlane.f32.xlu0 %v641_v48 }
 0x216   : > { %v529_v49 = vpop.xlane.xlu0 %528 }
 0x217   : > { %972 = vrcp.f32 %v529_v49  ;;  %v1125_v50 = vpop.f32.mrf.mxu1 }
 0x218   : > { %v497_v31 = vpack.c.bf16 %v1125_v50, %v1125_v50 }
 0x21d   : > { %v973_v51 = vpop.eup %972 }
 0x21e   : > { %v531_v52 = vmul.f32 %v973_v51, %v969_v45  ;;  %v643_v8 = vpop.xlane.xlu0 %642 }
 0x21f   : > { %v495_v53 = vpop.f32.mrf.mxu1 }
 0x220   : > { %v532_v54 = vpack.c.bf16 %v531_v52, %v531_v52 }
 0x222   : > { %911 = vmatmul.msk.bf16.vlgmr.msra.gmra.mxu3 %vm443_vm0, %v532_v54 }
 0x227   : > { %v572_v55 = vpop.f32.mrf.mxu1 }
 0x228   : > { %v576_v56 = vmul.f32 0.35355338, %v572_v55 }
 0x22a   : > { %v577_v57 = vadd.f32 %v1106_v11, %v576_v56 }
 0x22c   : > { %v578_v58 = vsel %vm443_vm0, %v577_v57, -inf }
 0x22d   : > { %579 = vmax.xlane.f32.xlu1 %v578_v58 }
 0x22f   : > { %v574_v59 = vpop.f32.mrf.mxu1 }
 0x2a0   : > { %v580_v60 = vpop.xlane.xlu1 %579 }
 0x2a1   : > { %v581_v61 = vsub.f32 %v577_v57, %v580_v60 }
 0x2a3   : > { %v582_v62 = vmul.f32 1.442695, %v581_v61 }
 0x2a5   : > { %974 = vpow2.f32 %v582_v62  ;;  %v545_v63 = vpop.f32.mrf.mxu3 }
 0x2a6   : > { %v549_v0 = vpack.c.bf16 %v545_v63, %v545_v63  ;;  %976 = vrcp.f32 %v643_v8 }
 0x2a8   : > { %v665_v1 = vunpack.c.l.b16 %v549_v0 }
 0x2aa   : > { %v666_v2 = vpack.c.b16 %v665_v1, %v665_v1  ;;  %v962_v1 = vld [vmem:[%s1184_s7] ss:$0 sm:$0xff] }
 0x2ab   : > { %v975_v3 = vpop.eup %974 }
 0x2ac   : > { %667 = vrot.lane.b32.xlu2 %v666_v2, %s1011_s29  ;;  %v584_v4 = vsel %vm443_vm0, %v975_v3, 0.0  ;;  %v977_v10 = vpop.eup %976 }
 0x2ad   : > { %v547_v5 = vpop.f32.mrf.mxu3  ;;  %585 = vadd.xlane.f32.xlu0 %v584_v4  ;;  %v645_v12 = vmul.f32 %v977_v10, %v971_v47 }
 0x2af   : > { %v646_v17 = vpack.c.bf16 %v645_v12, %v645_v12 }
 0x2c1   : > { %593 = vrot.lane.b32.xlu0 %v592_v7, %s1008_s20 }
 0x306   : > { %v668_v30 = vpop.permute.xlu2 %667 }
 0x307   : > { %v681_v32 = vsel %vm443_vm0, %v497_v31, %v668_v30 }
 0x320   : > { %v586_v9 = vpop.xlane.xlu0 %585 }
 0x321   : > { %978 = vrcp.f32 %v586_v9 }
 0x322   : > { %980 = vrcp.f32 %v1014_v44 }
 0x327   : > { %v979_v11 = vpop.eup %978 }
 0x328   : > { %v588_v13 = vmul.f32 %v979_v11, %v975_v3  ;;  %v981_v45 = vpop.eup %980  ;;  %v963_v3 = vld [vmem:[%s1185_s8] ss:$0 sm:$0xff] }
 0x329   : > { %v730_v46 = vmul.f32 32.0, %v981_v45  ;;  %vm734_vm5 = vweird.f32 %v981_v45 }
 0x32a   : > { %v589_v16 = vpack.c.bf16 %v588_v13, %v588_v13 }
 0x32b   : > { %v731_v47 = vsub.f32 1.0, %v730_v46 }
 0x32d   : > { %v732_v48 = vmul.f32 %v981_v45, %v731_v47 }
 0x32f   : > { %v733_v49 = vadd.f32 %v981_v45, %v732_v48 }
 0x331   : > { %v735_v50 = vsel %vm734_vm5, %v981_v45, %v733_v49 }
 0x333   : > { %v594_v14 = vpop.permute.xlu0 %593 }
 0x334   : > { %v599_v15 = vsel %vm480_vm1, %v594_v14, 0 }
 0x335   : > { %608 = vmatpush.bf16.msrb.mxu3 %v599_v15  ;;  %657 = vmatpush.bf16.msrb.mxu2 %v599_v15 }
 0x338   : > { %913 = vmatmul.msk.bf16.vlgmr.msrb.gmra.mxu3 %vm443_vm0, %v589_v16  ;;  %915 = vmatmul.msk.bf16.vlgmr.msrb.gmra.mxu2 %vm443_vm0, %v646_v17 }
 0x3bb   : > { %v610_v20 = vpop.f32.mrf.mxu3  ;;  %v659_v21 = vpop.f32.mrf.mxu2 }
 0x3bc   : > { %v614_v22 = vpack.c.bf16 %v610_v20, %v610_v20  ;;  %v663_v23 = vpack.c.bf16 %v659_v21, %v659_v21 }
 0x3be   : > { %v670_v24 = vunpack.c.l.b16 %v614_v22  ;;  %v675_v25 = vunpack.c.l.b16 %v663_v23 }
 0x3c0   : > { %v671_v26 = vpack.c.b16 %v670_v24, %v670_v24  ;;  %v676_v27 = vpack.c.b16 %v675_v25, %v675_v25 }
 0x3c2   : > { %677 = vrot.lane.b32.xlu0 %v676_v27, %s1012_s17  ;;  %672 = vrot.lane.b32.xlu1 %v671_v26, %s1013_s18 }
 0x3c3   : > { %v612_v28 = vpop.f32.mrf.mxu3  ;;  %v661_v29 = vpop.f32.mrf.mxu2 }
 0x434   : > { %v678_v33 = vpop.permute.xlu0 %677  ;;  %v673_v34 = vpop.permute.xlu1 %672 }
 0x435   : > { %v684_v35 = vsel %vm682_vm2, %v681_v32, %v673_v34 }
 0x436   : > { %v687_v36 = vsel %vm685_vm3, %v684_v35, %v678_v33 }
 0x437   : > { %924 = vmatmul.msk.bf16.vlgmr.msra.gmra.mxu1 %vm708_vm4, %v687_v36 }
 0x4b4   : > { %v720_v38 = vpop.f32.mrf.mxu1 }
 0x4b5   : > { %v721_v40 = vadd.f32 %v961_v37, %v720_v38 }
 0x4b7   : > { %v725_v41 = vadd.f32 %v724_v39, %v721_v40 }
 0x4b9   : > { %v726_v42 = vsel %vm708_vm4, %v725_v41, 0.0 }
 0x4ba   : > { %727 = vadd.xlane.f32.xlu0 %v726_v42 }
 0x4bc   : > { %v722_v43 = vpop.f32.mrf.mxu1 }
 0x52d   : > { %v728_v51 = vpop.xlane.xlu0 %727 }
 0x52e   : > { %v736_v52 = vmul.f32 %v735_v50, %v728_v51 }
 0x530   : > { %v737_v53 = vsub.f32 %v725_v41, %v736_v52 }
 0x532   : > { %v738_v54 = vmul.f32 %v737_v53, %v737_v53 }
 0x534   : > { %v739_v55 = vsel %vm708_vm4, %v738_v54, 0.0 }
 0x535   : > { %740 = vadd.xlane.f32.xlu2 %v739_v55 }
 0x5a8   : > { %v741_v56 = vpop.xlane.xlu2 %740 }
 0x5a9   : > { %v742_v57 = vmul.f32 %v741_v56, %v735_v50 }
 0x5ab   : > { %v743_v58 = vadd.f32 1e-05, %v742_v57 }
 0x5ad   : > { %982 = vrsqrt.f32 %v743_v58  ;;  %vm750_vm7 = vweird.f32 %v743_v58 }
 0x5b3   : > { %v983_v59 = vpop.eup %982 }
 0x5b4   : > { %v745_v60 = vmul.f32 %v983_v59, %v743_v58  ;;  %vm751_vm6 = vweird.f32 %v983_v59 }
 0x5b5   : > { %vm752_vm8 = vmor %vm750_vm7, %vm751_vm6 }
 0x5b6   : > { %v746_v61 = vmul.f32 %v983_v59, %v745_v60 }
 0x5b8   : > { %v747_v62 = vmul.f32 0.5, %v746_v61 }
 0x5ba   : > { %v748_v63 = vsub.f32 1.5, %v747_v62 }
 0x5bc   : > { %v749_v0 = vmul.f32 %v983_v59, %v748_v63 }
 0x5be   : > { %v753_v2 = vsel %vm752_vm8, %v983_v59, %v749_v0 }
 0x5bf   : > { %v754_v4 = vmul.f32 %v753_v2, %v737_v53 }
 0x5c1   : > { %v759_v5 = vmul.f32 %v962_v1, %v754_v4 }
 0x5c3   : > { %v764_v6 = vadd.f32 %v963_v3, %v759_v5 }
 0x5c5   : > { %765 = vst.msk [vmem:[%s434_s14] sm:$0xff] %vm708_vm4, %v764_v6 }
 0x5c6 PF: > { %s19_s11 = sadd.s32 1, %s1006_s11   ;;  %s1187_s30 = smov %s1002_s10 }
 0x5c7   : > { %p16_p5 = scmp.ge.s32.totalorder %s19_s11, 4   ;;  %s1188_s10 = smov %s1190_s12 }
 0x5c9   :  { %18 = sbr.rel (!%p16_p5) target bundleno = 2 (0x2), region = 98 }

// kernel: transformer_encoder.11
= control target key start
LH: loop header
LB: loop body
LE: loop exit
PB: predicated region body
PF: predicated region fallthrough
CT: control target
= control target key end

     0   :  { %s576_s0 = inlined_call_operand.vmem [shape: f32[16,32], index: 0, kind: input, shape index: {}]   ;;  %s577_s1 = inlined_call_operand.vmem [shape: bf16[32,128], index: 1, kind: input, shape index: {}]   ;;  %s578_s2 = inlined_call_operand.vmem [shape: f32[1,128], index: 2, kind: input, shape index: {}]   ;;  %s579_s3 = inlined_call_operand.vmem [shape: bf16[128,32], index: 3, kind: input, shape index: {}]   ;;  %s580_s4 = inlined_call_operand.vmem [shape: f32[1,32], index: 4, kind: input, shape index: {}]   ;;  %s581_s5 = inlined_call_operand.vmem [shape: f32[1,32], index: 5, kind: input, shape index: {}]   ;;  %s582_s6 = inlined_call_operand.vmem [shape: f32[1,32], index: 6, kind: input, shape index: {}]   ;;  %s583_s7 = inlined_call_operand.hbm [shape: f32[16,32], index: 7, kind: output, shape index: {}]  }
   0x1   :  { %v389_v0 = vld [vmem:[%s577_s1 + $0x8] sm:$0xff]  ;;  %v388_v1 = vld [vmem:[%s577_s1] sm:$0xff] }
   0x2   :  { %v497_v2 = vld [vmem:[%s576_s0] sm:$0xff]  ;;  %v502_v3 = vld [vmem:[%s576_s0 + $0x8] sm:$0xff]  ;;  %68 = vmatpush.bf16.msra.mxu0 %v389_v0 }
   0x3   :  { %12 = vsyncpa [#allocation4], 0  ;;  %v37_v4 = vpack.c.bf16 %v502_v3, %v497_v2  ;;  %vm32_vm0 = vcmask 261120   ;;  %v403_v5 = vld [vmem:[%s578_s2] ss:$0 sm:$0xff]  ;;  %v397_v6 = vld [vmem:[%s579_s3 + $0x38] sm:$0xff] }
   0x4   :  { %231 = vmatpush.bf16.msra.mxu1 %v397_v6  ;;  %v396_v10 = vld [vmem:[%s579_s3 + $0x30] sm:$0xff]  ;;  %v395_v12 = vld [vmem:[%s579_s3 + $0x28] sm:$0xff]  ;;  %v394_v17 = vld [vmem:[%s579_s3 + $0x20] sm:$0xff]  ;;  %v443_v56 = vmov 0.0   ;;  %s333_s8 = sshll.u32 %s583_s7, 4  ;;  %s447_s1 = smov 8   ;;  %s334_s8 = int_to_ptr.hbm [resolvable:$true] %s333_s8 }
   0x5   :  { %v393_v23 = vld [vmem:[%s579_s3 + $0x18] sm:$0xff]  ;;  %v392_v29 = vld [vmem:[%s579_s3 + $0x10] sm:$0xff]  ;;  %v391_v37 = vld [vmem:[%s579_s3 + $0x8] sm:$0xff]  ;;  %33 = vst.msk [vmem:[#allocation2] sm:$0xff] %vm32_vm0, %v443_v56 }
   0x6   :  { %69 = vmatpush.bf16.msra.mxu0 %v388_v1  ;;  %v390_v44 = vld [vmem:[%s579_s3] sm:$0xff]  ;;  %34 = vst.msk [vmem:[#allocation2 + $0x8] sm:$0xff] %vm32_vm0, %v443_v56 }
   0x8   :  { %232 = vmatpush.bf16.msra.mxu1 %v396_v10 }
   0x9   :  { %353 = vmatmul.msk.bf16.vlgmr.msra.gmra.mxu0 %vm32_vm0, %v37_v4 }
   0xc   :  { %233 = vmatpush.bf16.msra.mxu1 %v395_v12 }
  0x10   :  { %234 = vmatpush.bf16.msra.mxu1 %v394_v17 }
  0x14   :  { %235 = vmatpush.bf16.msra.mxu1 %v393_v23 }
  0x18   :  { %236 = vmatpush.bf16.msra.mxu1 %v392_v29 }
  0x1c   :  { %237 = vmatpush.bf16.msra.mxu1 %v391_v37 }
  0x20   :  { %238 = vmatpush.bf16.msra.mxu1 %v390_v44 }
  0x86   :  { %v71_v7 = vpop.f32.mrf.mxu0 }
  0x87   :  { %v513_v8 = vadd.f32 %v403_v5, %v71_v7 }
  0x89   :  { %v516_v9 = vmul.f32 0.70710677, %v513_v8 }
  0x8b   :  { %v80_v11 = vmul.f32 %v516_v9, %v516_v9 }
  0x8d   :  { %v81_v13 = vmin.f32 %v80_v11, 16.0 }
  0x8e   :  { %v73_v14 = vpop.f32.mrf.mxu0 }
  0x8f   :  { %v82_v15 = vmul.f32 2.1237322e-06, %v81_v13  ;;  %v526_v16 = vadd.f32 %v403_v5, %v73_v14  ;;  %v93_v18 = vmul.f32 3.8918573e-05, %v81_v13 }
  0x91   :  { %v83_v19 = vadd.f32 0.00028619796, %v82_v15  ;;  %v532_v20 = vmul.f32 0.70710677, %v526_v16  ;;  %v94_v21 = vadd.f32 0.001143296, %v93_v18 }
  0x93   :  { %v120_v22 = vmul.f32 %v532_v20, %v532_v20  ;;  %v84_v24 = vmul.f32 %v83_v19, %v81_v13  ;;  %v95_v25 = vmul.f32 %v94_v21, %v81_v13 }
  0x95   :  { %v121_v26 = vmin.f32 %v120_v22, 16.0  ;;  %v96_v27 = vadd.f32 0.014752088, %v95_v25  ;;  %v85_v31 = vadd.f32 0.0036580483, %v84_v24 }
  0x97   :  { %v122_v28 = vmul.f32 2.1237322e-06, %v121_v26  ;;  %v133_v30 = vmul.f32 3.8918573e-05, %v121_v26  ;;  %v97_v32 = vmul.f32 %v96_v27, %v81_v13  ;;  %v86_v39 = vmul.f32 %v85_v31, %v81_v13 }
  0x99   :  { %v123_v33 = vadd.f32 0.00028619796, %v122_v28  ;;  %v134_v34 = vadd.f32 0.001143296, %v133_v30  ;;  %v98_v35 = vadd.f32 0.112945676, %v97_v32 }
  0x9a   :  { %v87_v46 = vadd.f32 0.05243302, %v86_v39  ;;  %v164_v39 = vld [vmem:[#allocation2] sm:$0xff] }
  0x9b   :  { %v124_v36 = vmul.f32 %v123_v33, %v121_v26  ;;  %v135_v38 = vmul.f32 %v134_v34, %v121_v26  ;;  %v99_v40 = vmul.f32 %v98_v35, %v81_v13  ;;  %v76_v33 = vmul.f32 0.5, %v513_v8 }
  0x9c   :  { %v88_v52 = vmul.f32 %v87_v46, %v81_v13  ;;  %v77_v34 = vmul.f32 0.5, %v526_v16 }
  0x9d   :  { %v125_v41 = vadd.f32 0.0036580483, %v124_v36  ;;  %v136_v42 = vadd.f32 0.014752088, %v135_v38  ;;  %v100_v43 = vadd.f32 0.4994258, %v99_v40 }
  0x9e   :  { %v89_v57 = vadd.f32 0.18741608, %v88_v52 }
  0x9f   :  { %v137_v45 = vmul.f32 %v136_v42, %v121_v26  ;;  %v101_v47 = vmul.f32 %v100_v43, %v81_v13  ;;  %v126_v48 = vmul.f32 %v125_v41, %v121_v26  ;;  %v404_v42 = vld [vmem:[%s580_s4] ss:$0 sm:$0xff] }
  0xa0   :  { %v90_v62 = vmul.f32 %v89_v57, %v81_v13 }
  0xa1   :  { %v138_v49 = vadd.f32 0.112945676, %v137_v45  ;;  %v102_v50 = vadd.f32 1.0, %v101_v47  ;;  %v127_v53 = vadd.f32 0.05243302, %v126_v48 }
  0xa2   :  { %v91_v6 = vadd.f32 1.1283791, %v90_v62 }
  0xa3   :  { %v139_v51 = vmul.f32 %v138_v49, %v121_v26  ;;  %407 = vrcp.f32 %v102_v50  ;;  %v128_v58 = vmul.f32 %v127_v53, %v121_v26  ;;  %v114_v1 = vand.u32 2147483648, %v102_v50 }
  0xa4   :  { %v112_v5 = vand.u32 2147483647, %v102_v50  ;;  %vm108_vm2 = vweird.f32 %v102_v50  ;;  %v92_v17 = vmul.f32 %v91_v6, %v516_v9 }
  0xa5   :  { %v140_v54 = vadd.f32 0.4994258, %v139_v51  ;;  %v129_v63 = vadd.f32 0.18741608, %v128_v58  ;;  %v115_v12 = vor.u32 1.1754944e-38, %v114_v1  ;;  %v444_v51 = vmov 32.0  }
  0xa6   :  { %vm113_vm4 = vcmp.eq.f32.partialorder %v112_v5, 8.507059e+37 }
  0xa7   :  { %v141_v55 = vmul.f32 %v140_v54, %v121_v26  ;;  %v130_v10 = vmul.f32 %v129_v63, %v121_v26 }
  0xa9   :  { %v142_v59 = vadd.f32 1.0, %v141_v55  ;;  %v408_v60 = vpop.eup %407  ;;  %v131_v19 = vadd.f32 1.1283791, %v130_v10 }
  0xaa   :  { %v104_v61 = vmul.f32 %v408_v60, %v102_v50  ;;  %vm109_vm1 = vweird.f32 %v408_v60 }
  0xab   :  { %409 = vrcp.f32 %v142_v59  ;;  %vm110_vm3 = vmor %vm108_vm2, %vm109_vm1  ;;  %v154_v21 = vand.u32 2147483648, %v142_v59  ;;  %v152_v24 = vand.u32 2147483647, %v142_v59  ;;  %vm148_vm6 = vweird.f32 %v142_v59 }
  0xac   :  { %v105_v0 = vsub.f32 1.0, %v104_v61  ;;  %v132_v27 = vmul.f32 %v131_v19, %v532_v20  ;;  %v165_v20 = vld [vmem:[#allocation2 + $0x8] sm:$0xff]  ;;  %411 = vrcp.f32 %v444_v51 }
  0xad   :  { %v155_v26 = vor.u32 1.1754944e-38, %v154_v21  ;;  %vm153_vm8 = vcmp.eq.f32.partialorder %v152_v24, 8.507059e+37 }
  0xae   :  { %v106_v4 = vmul.f32 %v408_v60, %v105_v0 }
  0xb0   :  { %v107_v11 = vadd.f32 %v408_v60, %v106_v4 }
  0xb1   :  { %v410_v7 = vpop.eup %409 }
  0xb2   :  { %v144_v14 = vmul.f32 %v410_v7, %v142_v59  ;;  %v111_v15 = vsel %vm110_vm3, %v408_v60, %v107_v11  ;;  %vm149_vm5 = vweird.f32 %v410_v7  ;;  %v412_v52 = vpop.eup %411 }
  0xb3   :  { %v116_v18 = vsel %vm113_vm4, %v115_v12, %v111_v15  ;;  %vm150_vm7 = vmor %vm148_vm6, %vm149_vm5  ;;  %v269_v53 = vmul.f32 32.0, %v412_v52  ;;  %vm273_vm9 = vweird.f32 %v412_v52 }
  0xb4   :  { %v145_v13 = vsub.f32 1.0, %v144_v14  ;;  %v117_v22 = vmul.f32 %v116_v18, %v92_v17 }
  0xb5   :  { %v270_v54 = vsub.f32 1.0, %v269_v53 }
  0xb6   :  { %v146_v23 = vmul.f32 %v410_v7, %v145_v13  ;;  %v354_v28 = vclamps-f32 %v117_v22, 1.0  ;;  %v405_v22 = vld [vmem:[%s581_s5] ss:$0 sm:$0xff]  ;;  %s445_s5 = smov [#allocation3]  }
  0xb7   :  { %v271_v55 = vmul.f32 %v412_v52, %v270_v54  ;;  %s331_s28 = sshll.u32 %s445_s5, 4  ;;  %s332_s28 = int_to_ptr.vmem [resolvable:$true] %s331_s28 }
  0xb8   :  { %v147_v25 = vadd.f32 %v410_v7, %v146_v23  ;;  %v160_v32 = vadd.f32 1.0, %v354_v28 }
  0xb9   :  { %v272_v56 = vadd.f32 %v412_v52, %v271_v55 }
  0xba   :  { %v151_v29 = vsel %vm150_vm7, %v410_v7, %v147_v25  ;;  %v162_v36 = vmul.f32 %v160_v32, %v76_v33 }
  0xbb   :  { %v156_v30 = vsel %vm153_vm8, %v155_v26, %v151_v29  ;;  %v274_v57 = vsel %vm273_vm9, %v412_v52, %v272_v56  ;;  %v406_v26 = vld [vmem:[%s582_s6] ss:$0 sm:$0xff]  ;;  %s446_s6 = smov 128  }
  0xbc   :  { %v157_v31 = vmul.f32 %v156_v30, %v132_v27 }
  0xbe   :  { %v355_v9 = vclamps-f32 %v157_v31, 1.0 }
  0xc0   :  { %v161_v35 = vadd.f32 1.0, %v355_v9 }
  0xc2   :  { %v163_v37 = vmul.f32 %v161_v35, %v77_v34 }
  0xc4   :  { %v166_v38 = vpack.c.bf16 %v163_v37, %v162_v36 }
  0xc6   :  { %239 = vmatmul.bf16.vlgmr.msra.gmra.mxu1 %v166_v38 }
 0x143   :  { %v240_v40 = vpop.f32.mrf.mxu1 }
 0x144   :  { %v245_v41 = vadd.f32 %v240_v40, %v164_v39 }
 0x146   :  { %247 = vst.msk [vmem:[#allocation2] sm:$0xff] %vm32_vm0, %v245_v41 }
 0x14b   :  { %v242_v43 = vpop.f32.mrf.mxu1 }
 0x14c   :  { %v246_v44 = vadd.f32 %v242_v43, %v165_v20 }
 0x14d   :  { %v252_v8 = vld [vmem:[#allocation2] sm:$0xff] }
 0x14e   :  { %248 = vst.msk [vmem:[#allocation2 + $0x8] sm:$0xff] %vm32_vm0, %v246_v44  ;;  %v258_v16 = vadd.f32 %v404_v42, %v252_v8 }
 0x150   :  { %v260_v45 = vadd.f32 %v258_v16, %v497_v2 }
 0x152   :  { %v262_v46 = vsel %vm32_vm0, %v260_v45, 0.0 }
 0x153   :  { %263 = vadd.xlane.f32.xlu0 %v262_v46 }
 0x155   :  { %v253_v47 = vld [vmem:[#allocation2 + $0x8] sm:$0xff] }
 0x156   :  { %v259_v48 = vadd.f32 %v404_v42, %v253_v47 }
 0x158   :  { %v261_v49 = vadd.f32 %v259_v48, %v502_v3 }
 0x15a   :  { %v265_v50 = vsel %vm32_vm0, %v261_v49, 0.0 }
 0x15b   :  { %266 = vadd.xlane.f32.xlu0 %v265_v50 }
 0x1c6   :  { %v264_v2 = vpop.xlane.xlu0 %263 }
 0x1c7   :  { %v275_v58 = vmul.f32 %v274_v57, %v264_v2 }
 0x1c9   :  { %v277_v59 = vsub.f32 %v260_v45, %v275_v58 }
 0x1cb   :  { %v279_v60 = vmul.f32 %v277_v59, %v277_v59 }
 0x1cd   :  { %v281_v61 = vsel %vm32_vm0, %v279_v60, 0.0 }
 0x1ce   :  { %282 = vadd.xlane.f32.xlu1 %v281_v61  ;;  %v267_v3 = vpop.xlane.xlu0 %266 }
 0x1cf   :  { %v276_v62 = vmul.f32 %v274_v57, %v267_v3 }
 0x1d1   :  { %v278_v63 = vsub.f32 %v261_v49, %v276_v62 }
 0x1d3   :  { %v280_v0 = vmul.f32 %v278_v63, %v278_v63 }
 0x1d5   :  { %v284_v1 = vsel %vm32_vm0, %v280_v0, 0.0 }
 0x1d6   :  { %285 = vadd.xlane.f32.xlu1 %v284_v1 }
 0x241   :  { %v283_v4 = vpop.xlane.xlu1 %282 }
 0x242   :  { %v287_v5 = vmul.f32 %v283_v4, %v274_v57 }
 0x244   :  { %v289_v6 = vadd.f32 1e-05, %v287_v5 }
 0x246   :  { %413 = vrsqrt.f32 %v289_v6  ;;  %vm297_vm11 = vweird.f32 %v289_v6 }
 0x249   :  { %v286_v7 = vpop.xlane.xlu1 %285 }
 0x24a   :  { %v288_v10 = vmul.f32 %v286_v7, %v274_v57 }
 0x24c   :  { %v414_v11 = vpop.eup %413  ;;  %v290_v12 = vadd.f32 1e-05, %v288_v10 }
 0x24d   :  { %v292_v14 = vmul.f32 %v414_v11, %v289_v6  ;;  %vm298_vm10 = vweird.f32 %v414_v11 }
 0x24e   :  { %415 = vrsqrt.f32 %v290_v12  ;;  %vm299_vm12 = vmor %vm297_vm11, %vm298_vm10  ;;  %vm307_vm14 = vweird.f32 %v290_v12 }
 0x24f   :  { %v293_v15 = vmul.f32 %v414_v11, %v292_v14 }
 0x251   :  { %v294_v17 = vmul.f32 0.5, %v293_v15 }
 0x253   :  { %v295_v18 = vsub.f32 1.5, %v294_v17 }
 0x254   :  { %v416_v13 = vpop.eup %415 }
 0x255   :  { %v296_v19 = vmul.f32 %v414_v11, %v295_v18  ;;  %v302_v21 = vmul.f32 %v416_v13, %v290_v12  ;;  %vm308_vm13 = vweird.f32 %v416_v13 }
 0x256   :  { %vm309_vm15 = vmor %vm307_vm14, %vm308_vm13 }
 0x257   :  { %v300_v23 = vsel %vm299_vm12, %v414_v11, %v296_v19  ;;  %v303_v24 = vmul.f32 %v416_v13, %v302_v21 }
 0x258   :  { %v311_v25 = vmul.f32 %v300_v23, %v277_v59 }
 0x259   :  { %v304_v27 = vmul.f32 0.5, %v303_v24 }
 0x25a   :  { %v317_v28 = vmul.f32 %v405_v22, %v311_v25 }
 0x25b   :  { %v305_v29 = vsub.f32 1.5, %v304_v27 }
 0x25c   :  { %v323_v30 = vadd.f32 %v406_v26, %v317_v28 }
 0x25d   :  { %v306_v31 = vmul.f32 %v416_v13, %v305_v29 }
 0x25e   :  { %325 = vst.msk [vmem:[#allocation3] sm:$0xff] %vm32_vm0, %v323_v30 }
 0x25f   :  { %v310_v9 = vsel %vm309_vm15, %v416_v13, %v306_v31 }
 0x260   :  { %v312_v32 = vmul.f32 %v310_v9, %v278_v63 }
 0x262   :  { %v318_v33 = vmul.f32 %v405_v22, %v312_v32 }
 0x264   :  { %v324_v34 = vadd.f32 %v406_v26, %v318_v33 }
 0x266   :  { %326 = vst.msk [vmem:[#allocation3 + $0x8] sm:$0xff] %vm32_vm0, %v324_v34 }
 0x267   :  { %339 = dma.vmem_to_hbm [thread:$0]  %s332_s28, 256, %s334_s8, [#allocation4], %s446_s6, %s446_s6, %s447_s1  }
 0x268   :  { %441 = dma.done.wait [#allocation4], 256  }
 0x269   :  { %442 = vsyncadd [#allocation4], 4294967040 }
 0x26a   :  { %344 = vsyncpa [#allocation4], 1 }

</bundles_post_ra>
